<compile_context>
chip_gen: v7x
topology: tpu7x:2x2x1
jax: 0.10.0
libtpu: 0.0.40
codegen_flags: <defaults>
</compile_context>

<pallas_src>
import jax
import jax.numpy as jnp
from jax import lax
from jax.experimental import pallas as pl
from jax.experimental.pallas import tpu as pltpu


def _attention_kernel(theta_ref, g_ref, phi_ref, xq_ref, wo_ref, o_ref,
                      m_sc, l_sc, acc_sc):
    """One (batch, query-tile, key-tile) grid step.

    theta_ref : [1, C//8, TQ]  bf16 precomputed theta tile (resident across key axis)
    g_ref     : [1, C//2, TK]  bf16 precomputed g tile
    phi_ref   : [1, C//8, TK]  bf16 precomputed phi tile
    xq_ref    : [1, C,    TQ]  f32 x tile (residual path)
    wo_ref    : [C, C//2]      bf16 gamma-scaled output projection
    o_ref     : [1, C,    TQ]  f32 output tile (written at the last key step)
    m_sc/l_sc : [1, TQ]        f32 running max / denominator (lane-dense)
    acc_sc    : [C//2, TQ]     f32 running (unnormalized) attention output (lane-dense)
    """
    ki = pl.program_id(2)

    @pl.when(ki == 0)
    def _init():
        m_sc[...] = jnp.full_like(m_sc, -jnp.inf)
        l_sc[...] = jnp.zeros_like(l_sc)
        acc_sc[...] = jnp.zeros_like(acc_sc)

    theta = theta_ref[0]                                               # [c8, TQ] bf16
    phi = phi_ref[0]                                                   # [c8, TK] bf16
    g = g_ref[0]                                                       # [c2, TK] bf16

    # Transposed scores: s_t[k, q] = sum_c phi[c, k] * theta[c, q]  -> [TK, TQ]
    s_t = lax.dot_general(phi, theta,
                          dimension_numbers=(((0,), (0,)), ((), ())),
                          preferred_element_type=jnp.float32)

    # Online-softmax update over the key (sublane) axis; all state stays lane-dense.
    m_prev = m_sc[...]
    m_new = jnp.maximum(m_prev, s_t.max(axis=0, keepdims=True))        # [1, TQ]
    alpha = jnp.exp(m_prev - m_new)
    # exp stays f32 (v5e has no bf16 VPU/EUP); on v6e/v7x a bf16 exp is a further
    # micro-win but is skipped here for portability.
    p_t = jnp.exp(s_t - m_new)                                         # [TK, TQ] f32
    l_sc[...] = alpha * l_sc[...] + p_t.sum(axis=0, keepdims=True)
    acc_sc[...] = alpha * acc_sc[...] + jnp.dot(
        g, p_t.astype(jnp.bfloat16), preferred_element_type=jnp.float32)   # [c2, TQ]
    m_sc[...] = m_new

    @pl.when(ki == pl.num_programs(2) - 1)
    def _finalize():
        attn = acc_sc[...] * pl.reciprocal(l_sc[...], approx=True)     # [c2, TQ]
        # Output projection straight into the native [C, N] layout (lane-dense store);
        # wo_ref already carries the gamma factor.
        o_cn = jnp.dot(wo_ref[...], attn.astype(jnp.bfloat16),
                       preferred_element_type=jnp.float32)             # [C, TQ]
        o_ref[0] = (o_cn + xq_ref[0]).astype(o_ref.dtype)              # residual


def attention_forward(x, Wt, Wp, Wg, Wo, gamma, *, tile_q=256, tile_k=256):
    """x: [B, C, N] (PyTorch Conv1d layout) -> [B, C, N] f32."""
    B, C, N = x.shape
    c8, c2 = C // 8, C // 2
    assert C % 8 == 0 and c8 >= 1, "ch must be a multiple of 8"
    tile_q = min(tile_q, N)
    tile_k = min(tile_k, N)
    # v7x has 2 TensorCores: keep the parallel grid axes (B, qi) >= 2 work units.
    if B * (N // tile_q) < 2 and tile_q > 128 and N % (tile_q // 2) == 0:
        tile_q //= 2
    assert N % tile_q == 0 and N % tile_k == 0, "N must be divisible by the tiles"
    # TODO(synk): ragged N (non-multiple of the tiles) would need key-tile masking.

    x = jnp.asarray(x, jnp.float32)
    # One-shot pre-pass (tiny XLA einsums): hoist the 1x1 projections out of the key
    # loop and store them bf16, so the re-streamed key side costs ~3x fewer HBM bytes
    # and zero per-step projection MXU work.
    theta_p = jnp.einsum('oc,bcn->bon', jnp.asarray(Wt, jnp.float32), x).astype(jnp.bfloat16)
    phi_p = jnp.einsum('oc,bcn->bon', jnp.asarray(Wp, jnp.float32), x).astype(jnp.bfloat16)
    g_p = jnp.einsum('oc,bcn->bon', jnp.asarray(Wg, jnp.float32), x).astype(jnp.bfloat16)
    # gamma folded into the output projection (forward-equivalent).
    wo = (jnp.asarray(gamma, jnp.float32) * jnp.asarray(Wo, jnp.float32)).astype(jnp.bfloat16)

    n_q, n_k = N // tile_q, N // tile_k
    grid = (B, n_q, n_k)

    # Scoped-VMEM budget: double-buffered pipeline blocks + weights + scratch + headroom.
    # (v7x has only 64 MiB VMEM/TC; with the 256/256 defaults this stays far below.)
    bf16_blk = 2 * (c8 * tile_q + (c2 + c8) * tile_k + C * c2)
    f32_blk = 4 * (2 * C * tile_q)                      # x + output blocks
    scratch_bytes = 4 * tile_q * (c2 + 2)
    vmem_limit = int(max(2 * (bf16_blk + f32_blk) + scratch_bytes + (8 << 20), 32 << 20))

    cost = pl.CostEstimate(
        flops=int(2 * B * N * N * (c8 + c2) + 2 * B * C * c2 * N),
        transcendentals=int(B * N * N),
        bytes_accessed=int(8 * B * C * N                    # x in + out (f32)
                           + 2 * B * c8 * N                 # theta (read once)
                           + 2 * B * (c2 + c8) * N * n_q    # key-side replays
                           + 2 * C * c2),
    )

    return pl.pallas_call(
        _attention_kernel,
        out_shape=jax.ShapeDtypeStruct((B, C, N), jnp.float32),
        grid_spec=pltpu.PrefetchScalarGridSpec(
            num_scalar_prefetch=0,
            grid=grid,
            in_specs=[
                pl.BlockSpec((1, c8, tile_q), lambda b, qi, ki: (b, 0, qi)),  # theta
                pl.BlockSpec((1, c2, tile_k), lambda b, qi, ki: (b, 0, ki)),  # g
                pl.BlockSpec((1, c8, tile_k), lambda b, qi, ki: (b, 0, ki)),  # phi
                pl.BlockSpec((1, C, tile_q), lambda b, qi, ki: (b, 0, qi)),   # x (residual)
                pl.BlockSpec((C, c2), lambda b, qi, ki: (0, 0)),              # gamma*W_o
            ],
            out_specs=pl.BlockSpec((1, C, tile_q), lambda b, qi, ki: (b, 0, qi)),
            scratch_shapes=[
                pltpu.VMEM((1, tile_q), jnp.float32),    # running max
                pltpu.VMEM((1, tile_q), jnp.float32),    # running denominator
                pltpu.VMEM((c2, tile_q), jnp.float32),   # running accumulator
            ],
        ),
        compiler_params=pltpu.CompilerParams(
            dimension_semantics=("parallel", "parallel", "arbitrary"),
            vmem_limit_bytes=vmem_limit,
        ),
        cost_estimate=cost,
    )(theta_p, g_p, phi_p, x, wo)


# ----------------------------- pure-JAX f32 reference -----------------------------

def reference_forward(x, Wt, Wp, Wg, Wo, gamma):
    theta = jnp.einsum('oc,bcn->bon', Wt, x)            # [B, C/8, N]
    phi = jnp.einsum('oc,bcn->bon', Wp, x)              # [B, C/8, N]
    g = jnp.einsum('oc,bcn->bon', Wg, x)                # [B, C/2, N]
    scores = jnp.einsum('bci,bcj->bij', theta, phi)     # [B, N, N]
    beta = jax.nn.softmax(scores, axis=-1)
    attn = jnp.einsum('bcj,bij->bci', g, beta)          # [B, C/2, N]
    o = jnp.einsum('oc,bcn->bon', Wo, attn)             # [B, C, N]
    return gamma * o + x


if __name__ == "__main__":
    # ch=32 -> ch//8=4, ch//2=16; N=512 -> 2 query tiles x 2 key tiles at the 256
    # defaults, so the multi-step online-softmax path is actually exercised.
    B, C, N = 2, 32, 512

    key = jax.random.PRNGKey(0)
    kx, k1, k2, k3, k4 = jax.random.split(key, 5)
    scale = 0.15
    x = jax.random.normal(kx, (B, C, N), jnp.float32)
    Wt = scale * jax.random.normal(k1, (C // 8, C), jnp.float32)   # theta.weight[:, :, 0]
    Wp = scale * jax.random.normal(k2, (C // 8, C), jnp.float32)   # phi.weight[:, :, 0]
    Wg = scale * jax.random.normal(k3, (C // 2, C), jnp.float32)   # g.weight[:, :, 0]
    Wo = scale * jax.random.normal(k4, (C, C // 2), jnp.float32)   # o.weight[:, :, 0]
    # PyTorch initializes gamma to 0.0 (output == x); use a non-zero value here so the
    # attention path is actually exercised by the correctness check.
    gamma = jnp.float32(0.5)

    fwd = jax.jit(attention_forward, static_argnames=("tile_q", "tile_k"))
    out = jax.block_until_ready(fwd(x, Wt, Wp, Wg, Wo, gamma))
    ref = jax.block_until_ready(reference_forward(x, Wt, Wp, Wg, Wo, gamma))

    assert out.shape == (B, C, N), out.shape
    max_err = float(jnp.max(jnp.abs(out - ref)))
    # bf16 MXU operands with f32 accumulation -> loose tolerance vs the f32 reference.
    assert max_err < 5e-2, f"max abs err {max_err}"
    print("KERNEL_OK")
</pallas_src>

<mosaic_0001>
module attributes {stable_mosaic.version = 11 : i64} {
  func.func @_attention_kernel(%arg0: i32, %arg1: i32, %arg2: i32, %arg3: memref<1x4x256xbf16, #tpu.memory_space<vmem>>, %arg4: memref<1x16x256xbf16, #tpu.memory_space<vmem>>, %arg5: memref<1x4x256xbf16, #tpu.memory_space<vmem>>, %arg6: memref<1x32x256xf32, #tpu.memory_space<vmem>>, %arg7: memref<32x16xbf16, #tpu.memory_space<vmem>>, %arg8: memref<1x32x256xf32, #tpu.memory_space<vmem>>, %arg9: memref<1x256xf32, #tpu.memory_space<vmem>>, %arg10: memref<1x256xf32, #tpu.memory_space<vmem>>, %arg11: memref<16x256xf32, #tpu.memory_space<vmem>>) attributes {dimension_semantics = [#tpu.dimension_semantics<parallel>, #tpu.dimension_semantics<parallel>, #tpu.dimension_semantics<arbitrary>], iteration_bounds = array<i64: 2, 2, 2>, scalar_prefetch = 0 : i64, scratch_operands = 3 : i64, tpu.core_type = #tpu.core_type<tc>, window_params = [{transform_indices = @transform_0, window_bounds = array<i64: 1, 4, 256>}, {transform_indices = @transform_1, window_bounds = array<i64: 1, 16, 256>}, {transform_indices = @transform_2, window_bounds = array<i64: 1, 4, 256>}, {transform_indices = @transform_3, window_bounds = array<i64: 1, 32, 256>}, {pipeline_mode = #tpu.pipeline_mode<synchronous>, transform_indices = @transform_4, window_bounds = array<i64: 32, 16>}, {transform_indices = @transform_5, window_bounds = array<i64: 1, 32, 256>}]} {
    %c0_i32 = arith.constant 0 : i32
    %0 = arith.cmpi eq, %arg2, %c0_i32 : i32
    %1 = arith.extui %0 : i1 to i32
    %c0_i32_0 = arith.constant 0 : i32
    %2 = arith.cmpi ne, %1, %c0_i32_0 : i32
    scf.if %2 {
      %cst_25 = arith.constant 0xFF800000 : f32
      %36 = vector.broadcast %cst_25 : f32 to vector<1x256xf32>
      %c0_26 = arith.constant 0 : index
      %c0_27 = arith.constant 0 : index
      %37 = vector.load %arg9[%c0_26, %c0_27] : memref<1x256xf32, #tpu.memory_space<vmem>>, vector<1x256xf32>
      tpu.vector_store %arg9[%c0_26, %c0_27], %36 {strides = array<i32>} : memref<1x256xf32, #tpu.memory_space<vmem>>, vector<1x256xf32>,
      %cst_28 = arith.constant 0.000000e+00 : f32
      %38 = vector.broadcast %cst_28 : f32 to vector<1x256xf32>
      %c0_29 = arith.constant 0 : index
      %c0_30 = arith.constant 0 : index
      %39 = vector.load %arg10[%c0_29, %c0_30] : memref<1x256xf32, #tpu.memory_space<vmem>>, vector<1x256xf32>
      tpu.vector_store %arg10[%c0_29, %c0_30], %38 {strides = array<i32>} : memref<1x256xf32, #tpu.memory_space<vmem>>, vector<1x256xf32>,
      %cst_31 = arith.constant 0.000000e+00 : f32
      %40 = vector.broadcast %cst_31 : f32 to vector<16x256xf32>
      %c0_32 = arith.constant 0 : index
      %c0_33 = arith.constant 0 : index
      %41 = vector.load %arg11[%c0_32, %c0_33] : memref<16x256xf32, #tpu.memory_space<vmem>>, vector<16x256xf32>
      tpu.vector_store %arg11[%c0_32, %c0_33], %40 {strides = array<i32>} : memref<16x256xf32, #tpu.memory_space<vmem>>, vector<16x256xf32>,
    } else {
    }
    %c0 = arith.constant 0 : index
    %c0_1 = arith.constant 0 : index
    %c0_2 = arith.constant 0 : index
    %3 = vector.load %arg3[%c0, %c0_1, %c0_2] : memref<1x4x256xbf16, #tpu.memory_space<vmem>>, vector<1x4x256xbf16>
    %4 = vector.shape_cast %3 : vector<1x4x256xbf16> to vector<4x256xbf16>
    %c0_3 = arith.constant 0 : index
    %c0_4 = arith.constant 0 : index
    %c0_5 = arith.constant 0 : index
    %5 = vector.load %arg5[%c0_3, %c0_4, %c0_5] : memref<1x4x256xbf16, #tpu.memory_space<vmem>>, vector<1x4x256xbf16>
    %6 = vector.shape_cast %5 : vector<1x4x256xbf16> to vector<4x256xbf16>
    %c0_6 = arith.constant 0 : index
    %c0_7 = arith.constant 0 : index
    %c0_8 = arith.constant 0 : index
    %7 = vector.load %arg4[%c0_6, %c0_7, %c0_8] : memref<1x16x256xbf16, #tpu.memory_space<vmem>>, vector<1x16x256xbf16>
    %8 = vector.shape_cast %7 : vector<1x16x256xbf16> to vector<16x256xbf16>
    %cst = arith.constant dense<0.000000e+00> : vector<256x256xf32>
    %9 = tpu.matmul %6, %4, %cst {dimension_numbers = #tpu.dot_dimension_numbers<[0], [0], [1], [1], [0, 1, 1, 1], [], []>} : vector<4x256xbf16>, vector<4x256xbf16>, vector<256x256xf32> -> vector<256x256xf32>
    %c0_9 = arith.constant 0 : index
    %c0_10 = arith.constant 0 : index
    %10 = vector.load %arg9[%c0_9, %c0_10] : memref<1x256xf32, #tpu.memory_space<vmem>>, vector<1x256xf32>
    %cst_11 = arith.constant dense<0xFF800000> : vector<256xf32>
    %11 = vector.multi_reduction <maximumf>, %9, %cst_11 [0] : vector<256x256xf32> to vector<256xf32>
    %12 = vector.shape_cast %11 : vector<256xf32> to vector<1x256xf32>
    %13 = arith.maximumf %10, %12 : vector<1x256xf32>
    %14 = arith.subf %10, %13 : vector<1x256xf32>
    %15 = math.exp %14 : vector<1x256xf32>
    %16 = vector.broadcast %13 : vector<1x256xf32> to vector<256x256xf32>
    %17 = arith.subf %9, %16 : vector<256x256xf32>
    %18 = math.exp %17 : vector<256x256xf32>
    %c0_12 = arith.constant 0 : index
    %c0_13 = arith.constant 0 : index
    %19 = vector.load %arg10[%c0_12, %c0_13] : memref<1x256xf32, #tpu.memory_space<vmem>>, vector<1x256xf32>
    %20 = arith.mulf %15, %19 : vector<1x256xf32>
    %cst_14 = arith.constant dense<0.000000e+00> : vector<256xf32>
    %21 = vector.multi_reduction <add>, %18, %cst_14 [0] : vector<256x256xf32> to vector<256xf32>
    %22 = vector.shape_cast %21 : vector<256xf32> to vector<1x256xf32>
    %23 = arith.addf %20, %22 : vector<1x256xf32>
    %c0_15 = arith.constant 0 : index
    %c0_16 = arith.constant 0 : index
    %24 = vector.load %arg10[%c0_15, %c0_16] : memref<1x256xf32, #tpu.memory_space<vmem>>, vector<1x256xf32>
    tpu.vector_store %arg10[%c0_15, %c0_16], %23 {strides = array<i32>} : memref<1x256xf32, #tpu.memory_space<vmem>>, vector<1x256xf32>,
    %c0_17 = arith.constant 0 : index
    %c0_18 = arith.constant 0 : index
    %25 = vector.load %arg11[%c0_17, %c0_18] : memref<16x256xf32, #tpu.memory_space<vmem>>, vector<16x256xf32>
    %26 = vector.broadcast %15 : vector<1x256xf32> to vector<16x256xf32>
    %27 = arith.mulf %26, %25 : vector<16x256xf32>
    %28 = arith.truncf %18 : vector<256x256xf32> to vector<256x256xbf16>
    %cst_19 = arith.constant dense<0.000000e+00> : vector<16x256xf32>
    %29 = tpu.matmul %8, %28, %cst_19 {dimension_numbers = #tpu.dot_dimension_numbers<[1], [0], [0], [1], [0, 0, 1, 1], [], []>} : vector<16x256xbf16>, vector<256x256xbf16>, vector<16x256xf32> -> vector<16x256xf32>
    %30 = arith.addf %27, %29 : vector<16x256xf32>
    %c0_20 = arith.constant 0 : index
    %c0_21 = arith.constant 0 : index
    %31 = vector.load %arg11[%c0_20, %c0_21] : memref<16x256xf32, #tpu.memory_space<vmem>>, vector<16x256xf32>
    tpu.vector_store %arg11[%c0_20, %c0_21], %30 {strides = array<i32>} : memref<16x256xf32, #tpu.memory_space<vmem>>, vector<16x256xf32>,
    %c0_22 = arith.constant 0 : index
    %c0_23 = arith.constant 0 : index
    %32 = vector.load %arg9[%c0_22, %c0_23] : memref<1x256xf32, #tpu.memory_space<vmem>>, vector<1x256xf32>
    tpu.vector_store %arg9[%c0_22, %c0_23], %13 {strides = array<i32>} : memref<1x256xf32, #tpu.memory_space<vmem>>, vector<1x256xf32>,
    %c1_i32 = arith.constant 1 : i32
    %33 = arith.cmpi eq, %arg2, %c1_i32 : i32
    %34 = arith.extui %33 : i1 to i32
    %c0_i32_24 = arith.constant 0 : i32
    %35 = arith.cmpi ne, %34, %c0_i32_24 : i32
    scf.if %35 {
      %c0_25 = arith.constant 0 : index
      %c0_26 = arith.constant 0 : index
      %36 = vector.load %arg11[%c0_25, %c0_26] : memref<16x256xf32, #tpu.memory_space<vmem>>, vector<16x256xf32>
      %c0_27 = arith.constant 0 : index
      %c0_28 = arith.constant 0 : index
      %37 = vector.load %arg10[%c0_27, %c0_28] : memref<1x256xf32, #tpu.memory_space<vmem>>, vector<1x256xf32>
      %38 = tpu.reciprocal %37 {approx = true} : vector<1x256xf32> -> vector<1x256xf32>
      %39 = vector.broadcast %38 : vector<1x256xf32> to vector<16x256xf32>
      %40 = arith.mulf %36, %39 : vector<16x256xf32>
      %c0_29 = arith.constant 0 : index
      %c0_30 = arith.constant 0 : index
      %41 = vector.load %arg7[%c0_29, %c0_30] : memref<32x16xbf16, #tpu.memory_space<vmem>>, vector<32x16xbf16>
      %42 = arith.truncf %40 : vector<16x256xf32> to vector<16x256xbf16>
      %cst_31 = arith.constant dense<0.000000e+00> : vector<32x256xf32>
      %43 = tpu.matmul %41, %42, %cst_31 {dimension_numbers = #tpu.dot_dimension_numbers<[1], [0], [0], [1], [0, 0, 1, 1], [], []>} : vector<32x16xbf16>, vector<16x256xbf16>, vector<32x256xf32> -> vector<32x256xf32>
      %c0_32 = arith.constant 0 : index
      %c0_33 = arith.constant 0 : index
      %c0_34 = arith.constant 0 : index
      %44 = vector.load %arg6[%c0_32, %c0_33, %c0_34] : memref<1x32x256xf32, #tpu.memory_space<vmem>>, vector<1x32x256xf32>
      %45 = vector.shape_cast %44 : vector<1x32x256xf32> to vector<32x256xf32>
      %46 = arith.addf %43, %45 : vector<32x256xf32>
      %c0_35 = arith.constant 0 : index
      %c0_36 = arith.constant 0 : index
      %c0_37 = arith.constant 0 : index
      %47 = vector.load %arg8[%c0_35, %c0_36, %c0_37] : memref<1x32x256xf32, #tpu.memory_space<vmem>>, vector<1x32x256xf32>
      %48 = vector.shape_cast %47 : vector<1x32x256xf32> to vector<32x256xf32>
      %49 = vector.shape_cast %46 : vector<32x256xf32> to vector<1x32x256xf32>
      tpu.vector_store %arg8[%c0_35, %c0_36, %c0_37], %49 {strides = array<i32>} : memref<1x32x256xf32, #tpu.memory_space<vmem>>, vector<1x32x256xf32>,
    } else {
    }
    return
  }
  func.func @transform_0(%arg0: i32, %arg1: i32, %arg2: i32) -> (i32, i32, i32) {
    %c0_i32 = arith.constant 0 : i32
    %c0_i32_0 = arith.constant 0 : i32
    return %arg0, %c0_i32, %arg1 : i32, i32, i32
  }
  func.func @transform_1(%arg0: i32, %arg1: i32, %arg2: i32) -> (i32, i32, i32) {
    %c0_i32 = arith.constant 0 : i32
    %c0_i32_0 = arith.constant 0 : i32
    return %arg0, %c0_i32, %arg2 : i32, i32, i32
  }
  func.func @transform_2(%arg0: i32, %arg1: i32, %arg2: i32) -> (i32, i32, i32) {
    %c0_i32 = arith.constant 0 : i32
    %c0_i32_0 = arith.constant 0 : i32
    return %arg0, %c0_i32, %arg2 : i32, i32, i32
  }
  func.func @transform_3(%arg0: i32, %arg1: i32, %arg2: i32) -> (i32, i32, i32) {
    %c0_i32 = arith.constant 0 : i32
    %c0_i32_0 = arith.constant 0 : i32
    return %arg0, %c0_i32, %arg1 : i32, i32, i32
  }
  func.func @transform_4(%arg0: i32, %arg1: i32, %arg2: i32) -> (i32, i32) {
    %c0_i32 = arith.constant 0 : i32
    %c0_i32_0 = arith.constant 0 : i32
    %c0_i32_1 = arith.constant 0 : i32
    return %c0_i32, %c0_i32_0 : i32, i32
  }
  func.func @transform_5(%arg0: i32, %arg1: i32, %arg2: i32) -> (i32, i32, i32) {
    %c0_i32 = arith.constant 0 : i32
    %c0_i32_0 = arith.constant 0 : i32
    return %arg0, %c0_i32, %arg1 : i32, i32, i32
  }
}

</mosaic_0001>

<bundles_post_ra>
// kernel: attention_forward.1
= control target key start
LH: loop header
LB: loop body
LE: loop exit
PB: predicated region body
PF: predicated region fallthrough
CT: control target
= control target key end

     0   :  { %s2873_s0 = inlined_call_operand.vmem [shape: bf16[2,4,512], index: 0, kind: input, shape index: {}]   ;;  %s2874_s1 = inlined_call_operand.vmem [shape: bf16[2,16,512], index: 1, kind: input, shape index: {}]   ;;  %s2875_s2 = inlined_call_operand.vmem [shape: bf16[2,4,512], index: 2, kind: input, shape index: {}]   ;;  %s2876_s3 = inlined_call_operand.vmem [shape: f32[2,32,512], index: 3, kind: input, shape index: {}]   ;;  %s2877_s4 = inlined_call_operand.vmem [shape: bf16[32,16], index: 4, kind: input, shape index: {}]   ;;  %s2878_s5 = inlined_call_operand.hbm [shape: f32[2,32,512], index: 5, kind: output, shape index: {}]  }
   0x1   :  { %2939 = sst [smem:[#allocation45_spill]] %s2874_s1 }
   0x2   :  { %2940 = sst [smem:[#allocation46_spill]] %s2876_s3 }
   0x3   :  { %2941 = sst [smem:[#allocation47_spill]] %s2878_s5 }
   0x4   :  { %10 = vsyncpa [#allocation8], 0 }
   0x5   :  { %12 = vsyncpa [#allocation8 + $0x1], 0  ;;  %s2006_s18 = smov 0   ;;  %s2008_s19 = smov 0  }
   0x6   :  { %s2010_s20 = smov 0   ;;  %s2012_s21 = smov 0  }
   0x7   :  { %s2014_s22 = smov 0   ;;  %s2016_s23 = smov 0  }
   0x8   :  { %s2018_s24 = smov 0   ;;  %s2020_s25 = smov 0  }
   0x9   :  { %s2022_s26 = smov 0   ;;  %s2024_s27 = smov 0  }
   0xa   :  { %s2026_s28 = smov 0   ;;  %s2028_s29 = smov 0  }
   0xb LB: > { %2942 = sst [smem:[#allocation10_spill]] %s1921_s18  ;;  %s1534_s30 = sadd.s32 4294967295, %s1965_s29   ;;  %s1965_s29 = sphi %s2028_s29, %s18_s29   ;;  %s1961_s28 = sphi %s2026_s28, %s3099_s28   ;;  %s1957_s27 = sphi %s2024_s27, %s3098_s27   ;;  %s1953_s26 = sphi %s2022_s26, %s3097_s26   ;;  %s1949_s25 = sphi %s2020_s25, %s3096_s25   ;;  %s1945_s24 = sphi %s2018_s24, %s3095_s24   ;;  %s1941_s23 = sphi %s2016_s23, %s3094_s23   ;;  %s1937_s22 = sphi %s2014_s22, %s3104_s22   ;;  %s1933_s21 = sphi %s2012_s21, %s3103_s21   ;;  %s1929_s20 = sphi %s2010_s20, %s3102_s20   ;;  %s1925_s19 = sphi %s2008_s19, %s3101_s19   ;;  %s1921_s18 = sphi %s2006_s18, %s3100_s18  }
   0xc   : > { %2943 = sst [smem:[#allocation11_spill]] %s1953_s26  ;;  %s1535_s6 = sadd.s32 4294967294, %s1965_s29  }
   0xd   : > { %2944 = sst [smem:[#allocation12_spill]] %s1957_s27  ;;  %s30_s7 = sadd.s32 1, %s1953_s26 }
   0xe   : > { %2945 = sst [smem:[#allocation13_spill]] %s1961_s28  ;;  %p31_p0 = scmp.ge.s32.totalorder %s30_s7, 2 }
   0xf   : > { %s33_s8 = sadd.s32 1, %s1957_s27  ;;  %s37_s9 = sadd.s32 1, %s1961_s28 }
  0x10   : > { %p81_p1 = scmp.ne.s32.totalorder %s1937_s22, %s1933_s21  ;;  %s3106_s7 = smov (%p31_p0, %s30_s7), 0 }
  0x11   : > { %2946 = sst [smem:[#allocation14_spill]] %s3106_s7  ;;  %s3108_s8 = smov (!%p31_p0, %s33_s8), %s1957_s27 }
  0x12   : > { %s74_s10 = sadd.s32 1, %s1937_s22  ;;  %p82_p2 = scmp.eq.s32.totalorder %s1965_s29, 0 }
  0x13   : > { %p35_p3 = scmp.ge.s32.totalorder %s3108_s8, 2  ;;  %s70_s11 = ssub.s32 %s1953_s26, %s3106_s7 }
  0x14   : > { %p2080_p4 = por %p82_p2, %p81_p1  ;;  %p137_p5 = scmp.ne.s32.totalorder %s1929_s20, %s1925_s19 }
  0x15   : > { %s3110_s8 = smov (%p35_p3, %s3108_s8), 0  ;;  %s3112_s9 = smov (!%p35_p3, %s37_s9), %s1961_s28 }
  0x16   : > { %2948 = sst [smem:[#allocation15_spill]] %s3110_s8  ;;  %s126_s13 = ssub.s32 %s1957_s27, %s3110_s8 }
  0x17   : > { %p2091_p6 = por %p137_p5, %p82_p2  ;;  %p39_p7 = scmp.ge.s32.totalorder %s3112_s9, 2 }
  0x18   : > { %p190_p8 = scmp.eq.s32.totalorder %s1534_s30, 7  ;;  %p195_p9 = scmp.ne.s32.totalorder %s1925_s19, %s1921_s18 }
  0x19   : > { %p196_p10 = scmp.eq.s32.totalorder %s1535_s6, 7  ;;  %s3114_s9 = smov (%p39_p7, %s3112_s9), 0 }
  0x1a   : > { %2950 = sst [smem:[#allocation16_spill]] %s3114_s9  ;;  %p2099_p11 = por %p190_p8, %p137_p5 }
  0x1b   : > { %p2103_p12 = por %p196_p10, %p195_p9  ;;  %s69_s17 = ssub.s32 %s1961_s28, %s3114_s9 }
  0x1c   : > { %s130_s8 = sadd.s32 1, %s1929_s20  ;;  %s71_s7 = sor.u32 %s70_s11, %s69_s17 }
  0x1d   : > { %s2952_s16 = scalar_select %p2103_p12, 1, 0 }
  0x1e   : > { %s127_s5 = sor.u32 %s126_s13, %s69_s17  ;;  %p72_p13 = scmp.eq.s32.totalorder %s71_s7, 0 }
  0x1f   : > { %2953 = sst [smem:[#allocation17_spill]] %s2952_s16  ;;  %p128_p0 = scmp.eq.s32.totalorder %s127_s5, 0 }
  0x20   : > { %s2111_s30 = scalar_select %p72_p13, %s1937_s22, %s74_s10  }
  0x21   : > { %s2114_s6 = scalar_select %p128_p0, %s1929_s20, %s130_s8  }
  0x22   : > { %2954 = sst [smem:[#allocation18_spill]] %s2111_s30  ;;  %p1537_p1 = scmp.ge.s32.totalorder %s1965_s29, 8 }
  0x24   : > { %215 = sbr.rel (%p1537_p1) target bundleno = 68 (0x44), region = 20 }
  0x2b   : > { %231 = sbr.rel (!%p2080_p4) target bundleno = 54 (0x36), region = 28  ;;  %s233_s16 = sand.u32 (%p2080_p4), 1, %s1937_s22  }
  0x2c   : > { %s1539_s9 = sshll.u32 (%p2080_p4), %s1953_s26, 1  ;;  %s1538_s18 = sshll.u32 (%p2080_p4), %s233_s16, 4 }
  0x2d   : > { %s1540_s11 = sshll.u32 (%p2080_p4), %s1961_s28, 3  ;;  %s2955_s1 = sld [smem:[#allocation45_spill]] (%p2080_p4) }
  0x2e   : > { %s238_s13 = sadd.s32 (%p2080_p4), %s1540_s11, %s1539_s9  ;;  %s235_s17 = scalar_lea.vmem (%p2080_p4), [#allocation5], %s1538_s18 }
  0x2f   : > { %s1541_s7 = sshll.u32 (%p2080_p4), %s238_s13, 2 }
  0x33   : > { %s240_s8 = scalar_lea.vmem %s2955_s1, %s1541_s7 }
  0x34   : > { %v270_v0 = vld [vmem:[%s240_s8] sm:$0xff]  ;;  %v272_v1 = vld [vmem:[%s240_s8 + $0x10] sm:$0xff] }
  0x35   : > { %271 = vst [vmem:[%s235_s17] sm:$0xff] %v270_v0  ;;  %273 = vst [vmem:[%s235_s17 + $0x8] sm:$0xff] %v272_v1 }
  0x36 PF: > { %292 = sbr.rel (!%p2091_p6) target bundleno = 68 (0x44), region = 70  ;;  %s294_s12 = sand.u32 (%p2091_p6), 1, %s1929_s20  }
  0x37   : > { %s1543_s16 = sshll.u32 (%p2091_p6), %s1957_s27, 1  ;;  %s1542_s9 = sshll.u32 (%p2091_p6), %s294_s12, 6 }
  0x38   : > { %s1544_s11 = sshll.u32 (%p2091_p6), %s1961_s28, 4  ;;  %s2956_s3 = sld [smem:[#allocation46_spill]] (%p2091_p6) }
  0x39   : > { %s299_s13 = sadd.s32 (%p2091_p6), %s1544_s11, %s1543_s16  ;;  %s296_s18 = scalar_lea.vmem (%p2091_p6), [#allocation6], %s1542_s9 }
  0x3a   : > { %s1545_s26 = sshll.u32 (%p2091_p6), %s299_s13, 3 }
  0x3e   : > { %s301_s10 = scalar_lea.vmem %s2956_s3, %s1545_s26 }
  0x3f   : > { %v314_v2 = vld [vmem:[%s301_s10] sm:$0xff]  ;;  %v316_v3 = vld [vmem:[%s301_s10 + $0x8] sm:$0xff] }
  0x40   : > { %v318_v4 = vld [vmem:[%s301_s10 + $0x20] sm:$0xff]  ;;  %315 = vst [vmem:[%s296_s18] sm:$0xff] %v314_v2  ;;  %317 = vst [vmem:[%s296_s18 + $0x8] sm:$0xff] %v316_v3  ;;  %v320_v5 = vld [vmem:[%s301_s10 + $0x28] sm:$0xff] }
  0x41   : > { %319 = vst [vmem:[%s296_s18 + $0x10] sm:$0xff] %v318_v4  ;;  %v322_v6 = vld [vmem:[%s301_s10 + $0x40] sm:$0xff]  ;;  %v324_v7 = vld [vmem:[%s301_s10 + $0x48] sm:$0xff]  ;;  %321 = vst [vmem:[%s296_s18 + $0x18] sm:$0xff] %v320_v5 }
  0x42   : > { %323 = vst [vmem:[%s296_s18 + $0x20] sm:$0xff] %v322_v6  ;;  %325 = vst [vmem:[%s296_s18 + $0x28] sm:$0xff] %v324_v7  ;;  %v326_v8 = vld [vmem:[%s301_s10 + $0x60] sm:$0xff]  ;;  %v328_v9 = vld [vmem:[%s301_s10 + $0x68] sm:$0xff] }
  0x43   : > { %327 = vst [vmem:[%s296_s18 + $0x30] sm:$0xff] %v326_v8  ;;  %329 = vst [vmem:[%s296_s18 + $0x38] sm:$0xff] %v328_v9 }
  0x44 PF: > { %p1546_p2 = scmp.ge.s32.totalorder %s1965_s29, 1  ;;  %p334_p3 = scmp.lt.s32.totalorder %s1965_s29, 9 }
  0x46   : > { %p335_p4 = pnand %p1546_p2, %p334_p3 }
  0x48   : > { %338 = sbr.rel (%p335_p4) target bundleno = 1131 (0x46b), region = 93 }
  0x4f   : > { %s341_s26 = sand.u32 1, %s1933_s21   ;;  %s2886_s14 = sand.u32 1, %s1925_s19  }
  0x50   : > { %s2137_s8 = sshll.u32 %s341_s26, 4  ;;  %s1548_s17 = sshll.u32 %s2886_s14, 6 }
  0x51   : > { %s2142_s12 = sshll.u32 %s1945_s24, 1  ;;  %p398_p5 = scmp.lt.s32.totalorder %s1949_s25, 1 }
  0x52   : > { %p400_p6 = scmp.lt.s32.totalorder %s2142_s12, 3  ;;  %s1553_s16 = sshll.u32 %s1941_s23, 1 }
  0x53   : > { %s399_s9 = scalar_select %p398_p5, %s1949_s25, 1 }
  0x54   : > { %s401_s11 = scalar_select %p400_p6, %s2142_s12, 3 }
  0x55   : > { %s1551_s13 = sshll.u32 %s399_s9, 2  ;;  %p411_p7 = scmp.lt.s32.totalorder %s1553_s16, 3 }
  0x56   : > { %s403_s5 = sadd.s32 %s1551_s13, %s401_s11  ;;  %s343_s28 = scalar_lea.vmem [#allocation5], %s2137_s8 }
  0x57   : > { %s1552_s7 = sshll.u32 %s403_s5, 1  ;;  %s3116_s16 = smov (!%p411_p7, %s1553_s16), 3 }
  0x58   : > { %s405_s18 = scalar_lea.vmem %s2873_s0, %s1552_s7  ;;  %s414_s26 = sadd.s32 %s1551_s13, %s3116_s16 }
  0x59   : > { %s1555_s14 = sshll.u32 %s414_s26, 1  ;;  %s2156_s27 = scalar_lea.vmem [#allocation6], %s1548_s17 }
  0x5a   : > { %s416_s3 = scalar_lea.vmem %s2875_s2, %s1555_s14  ;;  %s2158_s30 = scalar_lea.vmem [#allocation7], %s1548_s17 }
  0x5b   : > { %p1556_p8 = scmp.ne.s32.totalorder %s1941_s23, 0 }
  0x5c   : > { %v425_v10 = vlaneseq (!%p1556_p8)  ;;  %v1967_v11 = vmov (!%p1556_p8), 0.0   ;;  %v1968_v12 = vmov (!%p1556_p8), -inf  }
  0x5d   : > { %424 = sbr.rel (%p1556_p8) target bundleno = 100 (0x64), region = 105  ;;  %431 = vst [vmem:[#allocation4] sm:$0xff] (!%p1556_p8), %v1967_v11  ;;  %432 = vst [vmem:[#allocation4 + $0x8] sm:$0xff] (!%p1556_p8), %v1967_v11 }
  0x5e   : > { %433 = vst [vmem:[#allocation4 + $0x10] sm:$0xff] (!%p1556_p8), %v1967_v11  ;;  %434 = vst [vmem:[#allocation4 + $0x18] sm:$0xff] (!%p1556_p8), %v1967_v11  ;;  %vm427_vm0 = vcmp.lt.s32.totalorder (!%p1556_p8), %v425_v10, 256 }
  0x5f   : > { %429 = vst.msk [vmem:[#allocation2] sm:$0x3] (!%p1556_p8), %vm427_vm0, %v1968_v12  ;;  %430 = vst.msk [vmem:[#allocation3] sm:$0x3] (!%p1556_p8), %vm427_vm0, %v1967_v11 }
  0x64 PF: > { %v1557_v13 = vld.sshfl [vmem:[%s416_s3] sm:$0x33 pattern:$0x76325410]  ;;  %vm540_vm1 = vcmask 1041408   ;;  %v1969_v15 = vmov 0  }
  0x65   : > { %450 = vxpose.xlu0.c.b16.start.end [1/1] (short) %v1557_v13, 128  ;;  %v1558_v14 = vld.sshfl [vmem:[%s405_s18] sm:$0x33 pattern:$0x76325410]  ;;  %579 = vmatprep.mubr.bf16.mxu0 %v1969_v15  ;;  %v447_v18 = vcombine.high %v1557_v13, %v1557_v13  ;;  %vm491_vm2 = vcmask 31744   ;;  %p1578_p9 = scmp.ne.s32.totalorder %s1941_s23, 1 }
  0x66   : > { %v490_v16 = vcombine.high %v1558_v14, %v1558_v14  ;;  %v542_v17 = vsel %vm540_vm1, %v1558_v14, 0  ;;  %vm1302_vm4 = vcmask (!%p1578_p9), 130048  }
  0x68   : > { %1559 = vmatprep.subr.msk.bf16.mxu0 %vm540_vm1, %v490_v16 }
  0x69   : > { %548 = vmatpush1.bf16.msra.mxu0 %v542_v17 }
  0x82   : > { %466 = vxpose.xlu0.c.b16.start.end [1/1] (short) %v447_v18, 128 }
  0xcb   : > { %v458_v19 = vpop.trf.xlu0 }
  0xcc   : > { %1560 = vmatmul.mubr.msk.bf16.vlgmr.msra.gmra.mrb[0].mxu0 %vm491_vm2, %v458_v19 }
  0xcd   : > { %589 = vmatprep.mubr.bf16.mxu0 %v1969_v15 }
  0xcf   : > { %v459_v20 = vpop.trf.xlu0 }
  0xd3   : > { %v460_v21 = vpop.trf.xlu0 }
  0xd4   : > { %1561 = vmatmul.mubr.msk.bf16.gmra.mrb[4].mxu0 %vm491_vm2, %v459_v20 }
  0xd5   : > { %599 = vmatprep.mubr.bf16.mxu0 %v1969_v15 }
  0xd7   : > { %v461_v22 = vpop.trf.xlu0 }
  0xdb   : > { %v462_v23 = vpop.trf.xlu0 }
  0xdc   : > { %1562 = vmatmul.mubr.msk.bf16.gmra.mrb[8].mxu0 %vm491_vm2, %v460_v21 }
  0xdd   : > { %609 = vmatprep.mubr.bf16.mxu0 %v1969_v15 }
  0xdf   : > { %v463_v24 = vpop.trf.xlu0 }
  0xe3   : > { %v464_v25 = vpop.trf.xlu0 }
  0xe4   : > { %1563 = vmatmul.mubr.msk.bf16.gmra.mrb[12].mxu0 %vm491_vm2, %v461_v22 }
  0xe5   : > { %619 = vmatprep.mubr.bf16.mxu0 %v1969_v15 }
  0xe7   : > { %v465_v26 = vpop.trf.xlu0 }
  0xeb   : > { %v474_v27 = vpop.trf.xlu0 }
  0xec   : > { %1564 = vmatmul.mubr.msk.bf16.gmra.mrb[16].mxu0 %vm491_vm2, %v462_v23 }
  0xed   : > { %629 = vmatprep.mubr.bf16.mxu0 %v1969_v15 }
  0xef   : > { %v475_v28 = vpop.trf.xlu0 }
  0xf3   : > { %v476_v29 = vpop.trf.xlu0 }
  0xf4   : > { %1565 = vmatmul.mubr.msk.bf16.gmra.mrb[20].mxu0 %vm491_vm2, %v463_v24 }
  0xf5   : > { %639 = vmatprep.mubr.bf16.mxu0 %v1969_v15 }
  0xf7   : > { %v477_v30 = vpop.trf.xlu0 }
  0xfb   : > { %v478_v31 = vpop.trf.xlu0 }
  0xfc   : > { %1566 = vmatmul.mubr.msk.bf16.gmra.mrb[24].mxu0 %vm491_vm2, %v464_v25 }
  0xfd   : > { %649 = vmatprep.mubr.bf16.mxu0 %v1969_v15 }
  0xff   : > { %v479_v32 = vpop.trf.xlu0 }
 0x103   : > { %v480_v33 = vpop.trf.xlu0 }
 0x104   : > { %1567 = vmatmul.mubr.msk.bf16.gmra.mrb[28].mxu0 %vm491_vm2, %v465_v26 }
 0x105   : > { %659 = vmatprep.mubr.bf16.mxu0 %v1969_v15 }
 0x107   : > { %v481_v34 = vpop.trf.xlu0 }
 0x10c   : > { %1568 = vmatmul.mubr.msk.bf16.gmra.mrb[32].mxu0 %vm491_vm2, %v474_v27 }
 0x10d   : > { %669 = vmatprep.mubr.bf16.mxu0 %v1969_v15 }
 0x114   : > { %1569 = vmatmul.mubr.msk.bf16.gmra.mrb[36].mxu0 %vm491_vm2, %v475_v28 }
 0x115   : > { %679 = vmatprep.mubr.bf16.mxu0 %v1969_v15 }
 0x11c   : > { %1570 = vmatmul.mubr.msk.bf16.gmra.mrb[40].mxu0 %vm491_vm2, %v476_v29 }
 0x11d   : > { %689 = vmatprep.mubr.bf16.mxu0 %v1969_v15 }
 0x124   : > { %1571 = vmatmul.mubr.msk.bf16.gmra.mrb[44].mxu0 %vm491_vm2, %v477_v30 }
 0x125   : > { %699 = vmatprep.mubr.bf16.mxu0 %v1969_v15 }
 0x12c   : > { %1572 = vmatmul.mubr.msk.bf16.gmra.mrb[48].mxu0 %vm491_vm2, %v478_v31 }
 0x12d   : > { %709 = vmatprep.mubr.bf16.mxu0 %v1969_v15 }
 0x134   : > { %1573 = vmatmul.mubr.msk.bf16.gmra.mrb[52].mxu0 %vm491_vm2, %v479_v32 }
 0x135   : > { %719 = vmatprep.mubr.bf16.mxu0 %v1969_v15 }
 0x13c   : > { %1574 = vmatmul.mubr.msk.bf16.gmra.mrb[56].mxu0 %vm491_vm2, %v480_v33 }
 0x13d   : > { %729 = vmatprep.mubr.bf16.mxu0 %v1969_v15 }
 0x144   : > { %1575 = vmatmul.mubr.msk.bf16.gmra.mrb[60].mxu0 %vm491_vm2, %v481_v34 }
 0x19f   : > { %v2177_v35 = vpop.f32.mrb[0].mxu0 }
 0x1a0   : > { %v2179_v36 = vpop.f32.mrb[1].mxu0 }
 0x1a1   : > { %v2181_v37 = vpop.f32.mrb[2].mxu0 }
 0x1a2   : > { %v2183_v38 = vpop.f32.mrb[3].mxu0 }
 0x1a7   : > { %v2185_v39 = vpop.f32.mrb[4].mxu0 }
 0x1a8   : > { %v741_v40 = vmax.f32 %v2177_v35, %v2185_v39  ;;  %v2189_v41 = vpop.f32.mrb[5].mxu0 }
 0x1a9   : > { %v778_v42 = vmax.f32 %v2179_v36, %v2189_v41  ;;  %v2193_v43 = vpop.f32.mrb[6].mxu0 }
 0x1aa   : > { %v742_v44 = vmax.f32 %v2181_v37, %v2193_v43  ;;  %v2197_v45 = vpop.f32.mrb[7].mxu0 }
 0x1ab   : > { %v779_v46 = vmax.f32 %v2183_v38, %v2197_v45 }
 0x1af   : > { %v2201_v47 = vpop.f32.mrb[8].mxu0 }
 0x1b0   : > { %v743_v48 = vmax.f32 %v741_v40, %v2201_v47  ;;  %v2204_v49 = vpop.f32.mrb[9].mxu0 }
 0x1b1   : > { %v780_v50 = vmax.f32 %v778_v42, %v2204_v49  ;;  %v2207_v51 = vpop.f32.mrb[10].mxu0 }
 0x1b2   : > { %v744_v52 = vmax.f32 %v742_v44, %v2207_v51  ;;  %v2210_v53 = vpop.f32.mrb[11].mxu0 }
 0x1b3   : > { %v781_v54 = vmax.f32 %v779_v46, %v2210_v53 }
 0x1b7   : > { %v2213_v55 = vpop.f32.mrb[12].mxu0 }
 0x1b8   : > { %v745_v56 = vmax.f32 %v743_v48, %v2213_v55  ;;  %v2216_v57 = vpop.f32.mrb[13].mxu0 }
 0x1b9   : > { %v782_v58 = vmax.f32 %v780_v50, %v2216_v57  ;;  %v2219_v59 = vpop.f32.mrb[14].mxu0 }
 0x1ba   : > { %v746_v60 = vmax.f32 %v744_v52, %v2219_v59  ;;  %v2222_v61 = vpop.f32.mrb[15].mxu0 }
 0x1bb   : > { %v783_v62 = vmax.f32 %v781_v54, %v2222_v61 }
 0x1bf   : > { %v2225_v63 = vpop.f32.mrb[16].mxu0 }
 0x1c0   : > { %v747_v0 = vmax.f32 %v745_v56, %v2225_v63  ;;  %v2228_v1 = vpop.f32.mrb[17].mxu0 }
 0x1c1   : > { %v784_v2 = vmax.f32 %v782_v58, %v2228_v1  ;;  %v2231_v3 = vpop.f32.mrb[18].mxu0 }
 0x1c2   : > { %v748_v4 = vmax.f32 %v746_v60, %v2231_v3  ;;  %v2234_v5 = vpop.f32.mrb[19].mxu0 }
 0x1c3   : > { %v785_v6 = vmax.f32 %v783_v62, %v2234_v5 }
 0x1c7   : > { %v2237_v7 = vpop.f32.mrb[20].mxu0 }
 0x1c8   : > { %v749_v8 = vmax.f32 %v747_v0, %v2237_v7  ;;  %v2240_v9 = vpop.f32.mrb[21].mxu0 }
 0x1c9   : > { %v786_v10 = vmax.f32 %v784_v2, %v2240_v9  ;;  %v2243_v11 = vpop.f32.mrb[22].mxu0 }
 0x1ca   : > { %v750_v12 = vmax.f32 %v748_v4, %v2243_v11  ;;  %v2246_v13 = vpop.f32.mrb[23].mxu0 }
 0x1cb   : > { %v787_v14 = vmax.f32 %v785_v6, %v2246_v13 }
 0x1cf   : > { %v2249_v15 = vpop.f32.mrb[24].mxu0 }
 0x1d0   : > { %v751_v16 = vmax.f32 %v749_v8, %v2249_v15  ;;  %v2252_v17 = vpop.f32.mrb[25].mxu0 }
 0x1d1   : > { %v788_v18 = vmax.f32 %v786_v10, %v2252_v17  ;;  %v2255_v19 = vpop.f32.mrb[26].mxu0 }
 0x1d2   : > { %v752_v20 = vmax.f32 %v750_v12, %v2255_v19  ;;  %v2258_v21 = vpop.f32.mrb[27].mxu0 }
 0x1d3   : > { %v789_v22 = vmax.f32 %v787_v14, %v2258_v21 }
 0x1d7   : > { %v2261_v23 = vpop.f32.mrb[28].mxu0 }
 0x1d8   : > { %v753_v24 = vmax.f32 %v751_v16, %v2261_v23  ;;  %v2264_v25 = vpop.f32.mrb[29].mxu0 }
 0x1d9   : > { %v790_v26 = vmax.f32 %v788_v18, %v2264_v25  ;;  %v2267_v27 = vpop.f32.mrb[30].mxu0 }
 0x1da   : > { %v754_v28 = vmax.f32 %v752_v20, %v2267_v27  ;;  %v2270_v29 = vpop.f32.mrb[31].mxu0 }
 0x1db   : > { %v791_v30 = vmax.f32 %v789_v22, %v2270_v29 }
 0x1df   : > { %v2273_v31 = vpop.f32.mrb[32].mxu0 }
 0x1e0   : > { %v755_v32 = vmax.f32 %v753_v24, %v2273_v31  ;;  %v2276_v33 = vpop.f32.mrb[33].mxu0 }
 0x1e1   : > { %v792_v34 = vmax.f32 %v790_v26, %v2276_v33  ;;  %v2279_v40 = vpop.f32.mrb[34].mxu0 }
 0x1e2   : > { %v756_v42 = vmax.f32 %v754_v28, %v2279_v40  ;;  %v2282_v44 = vpop.f32.mrb[35].mxu0 }
 0x1e3   : > { %v793_v46 = vmax.f32 %v791_v30, %v2282_v44 }
 0x1e7   : > { %v2285_v48 = vpop.f32.mrb[36].mxu0 }
 0x1e8   : > { %v757_v50 = vmax.f32 %v755_v32, %v2285_v48  ;;  %v2288_v52 = vpop.f32.mrb[37].mxu0 }
 0x1e9   : > { %v794_v54 = vmax.f32 %v792_v34, %v2288_v52  ;;  %v2291_v56 = vpop.f32.mrb[38].mxu0 }
 0x1ea   : > { %v758_v58 = vmax.f32 %v756_v42, %v2291_v56  ;;  %v2294_v60 = vpop.f32.mrb[39].mxu0 }
 0x1eb   : > { %v795_v62 = vmax.f32 %v793_v46, %v2294_v60 }
 0x1ef   : > { %v2297_v0 = vpop.f32.mrb[40].mxu0 }
 0x1f0   : > { %2957 = vst [vmem:[#allocation19_spill] sm:$0xff] %v2297_v0  ;;  %v759_v2 = vmax.f32 %v757_v50, %v2297_v0  ;;  %v2300_v4 = vpop.f32.mrb[41].mxu0 }
 0x1f1   : > { %2958 = vst [vmem:[#allocation20_spill] sm:$0xff] %v2300_v4  ;;  %v796_v6 = vmax.f32 %v794_v54, %v2300_v4  ;;  %v2303_v8 = vpop.f32.mrb[42].mxu0 }
 0x1f2   : > { %2959 = vst [vmem:[#allocation21_spill] sm:$0xff] %v2303_v8  ;;  %v760_v10 = vmax.f32 %v758_v58, %v2303_v8  ;;  %v2306_v12 = vpop.f32.mrb[43].mxu0 }
 0x1f3   : > { %2960 = vst [vmem:[#allocation22_spill] sm:$0xff] %v2306_v12  ;;  %v797_v14 = vmax.f32 %v795_v62, %v2306_v12 }
 0x1f7   : > { %v2309_v16 = vpop.f32.mrb[44].mxu0 }
 0x1f8   : > { %2961 = vst [vmem:[#allocation23_spill] sm:$0xff] %v2309_v16  ;;  %v761_v18 = vmax.f32 %v759_v2, %v2309_v16  ;;  %v2312_v20 = vpop.f32.mrb[45].mxu0 }
 0x1f9   : > { %2962 = vst [vmem:[#allocation24_spill] sm:$0xff] %v2312_v20  ;;  %v798_v22 = vmax.f32 %v796_v6, %v2312_v20  ;;  %v2315_v24 = vpop.f32.mrb[46].mxu0  ;;  %v1970_v20 = vmov 1966171168  }
 0x1fa   : > { %2963 = vst [vmem:[#allocation25_spill] sm:$0xff] %v2315_v24  ;;  %v762_v26 = vmax.f32 %v760_v10, %v2315_v24  ;;  %v2318_v28 = vpop.f32.mrb[47].mxu0 }
 0x1fb   : > { %2964 = vst [vmem:[#allocation26_spill] sm:$0xff] %v2318_v28  ;;  %v799_v30 = vmax.f32 %v797_v14, %v2318_v28 }
 0x1ff   : > { %v2321_v32 = vpop.f32.mrb[48].mxu0 }
 0x200   : > { %2965 = vst [vmem:[#allocation27_spill] sm:$0xff] %v2321_v32  ;;  %v763_v34 = vmax.f32 %v761_v18, %v2321_v32  ;;  %v2324_v42 = vpop.f32.mrb[49].mxu0 }
 0x201   : > { %2966 = vst [vmem:[#allocation28_spill] sm:$0xff] %v2324_v42  ;;  %v800_v46 = vmax.f32 %v798_v22, %v2324_v42  ;;  %v2327_v50 = vpop.f32.mrb[50].mxu0 }
 0x202   : > { %2967 = vst [vmem:[#allocation29_spill] sm:$0xff] %v2327_v50  ;;  %v764_v54 = vmax.f32 %v762_v26, %v2327_v50  ;;  %v2330_v58 = vpop.f32.mrb[51].mxu0 }
 0x203   : > { %2968 = vst [vmem:[#allocation30_spill] sm:$0xff] %v2330_v58  ;;  %v801_v62 = vmax.f32 %v799_v30, %v2330_v58 }
 0x207   : > { %v2333_v2 = vpop.f32.mrb[52].mxu0 }
 0x208   : > { %2969 = vst [vmem:[#allocation31_spill] sm:$0xff] %v2333_v2  ;;  %v765_v6 = vmax.f32 %v763_v34, %v2333_v2  ;;  %v2336_v10 = vpop.f32.mrb[53].mxu0 }
 0x209   : > { %2970 = vst [vmem:[#allocation32_spill] sm:$0xff] %v2336_v10  ;;  %v802_v14 = vmax.f32 %v800_v46, %v2336_v10  ;;  %v2339_v18 = vpop.f32.mrb[54].mxu0 }
 0x20a   : > { %2971 = vst [vmem:[#allocation33_spill] sm:$0xff] %v2339_v18  ;;  %v766_v22 = vmax.f32 %v764_v54, %v2339_v18  ;;  %v2342_v42 = vpop.f32.mrb[55].mxu0 }
 0x20b   : > { %2972 = vst [vmem:[#allocation34_spill] sm:$0xff] %v2342_v42  ;;  %v803_v26 = vmax.f32 %v801_v62, %v2342_v42 }
 0x20f   : > { %v2345_v50 = vpop.f32.mrb[56].mxu0 }
 0x210   : > { %2973 = vst [vmem:[#allocation35_spill] sm:$0xff] %v2345_v50  ;;  %v767_v30 = vmax.f32 %v765_v6, %v2345_v50  ;;  %v2348_v58 = vpop.f32.mrb[57].mxu0 }
 0x211   : > { %2974 = vst [vmem:[#allocation36_spill] sm:$0xff] %v2348_v58  ;;  %v804_v34 = vmax.f32 %v802_v14, %v2348_v58  ;;  %v2351_v2 = vpop.f32.mrb[58].mxu0 }
 0x212   : > { %2975 = vst [vmem:[#allocation37_spill] sm:$0xff] %v2351_v2  ;;  %v768_v46 = vmax.f32 %v766_v22, %v2351_v2  ;;  %v2354_v10 = vpop.f32.mrb[59].mxu0 }
 0x213   : > { %2976 = vst [vmem:[#allocation38_spill] sm:$0xff] %v2354_v10  ;;  %v805_v54 = vmax.f32 %v803_v26, %v2354_v10 }
 0x217   : > { %v2357_v18 = vpop.f32.mrb[60].mxu0 }
 0x218   : > { %2977 = vst [vmem:[#allocation39_spill] sm:$0xff] %v2357_v18  ;;  %v769_v62 = vmax.f32 %v767_v30, %v2357_v18  ;;  %v2360_v42 = vpop.f32.mrb[61].mxu0  ;;  %v819_v30 = vunpack.c.l.s4 %v1970_v20  ;;  %v821_v18 = vlaneseq }
 0x219   : > { %2978 = vst [vmem:[#allocation40_spill] sm:$0xff] %v2360_v42  ;;  %v806_v6 = vmax.f32 %v804_v34, %v2360_v42  ;;  %v2363_v50 = vpop.f32.mrb[62].mxu0 }
 0x21a   : > { %2979 = vst [vmem:[#allocation41_spill] sm:$0xff] %v2363_v50  ;;  %v770_v14 = vmax.f32 %v768_v46, %v2363_v50  ;;  %v2366_v58 = vpop.f32.mrb[63].mxu0  ;;  %v820_v8 = vunpack.c.0.s8 %v819_v30  ;;  %v822_v46 = vshrl.u32 %v821_v18, 7  ;;  %vm2379_vm3 = vcmp.lt.s32.totalorder %v821_v18, 256 }
 0x21b   : > { %2980 = vst [vmem:[#allocation42_spill] sm:$0xff] %v2366_v58  ;;  %v807_v22 = vmax.f32 %v805_v54, %v2366_v58 }
 0x21c   : > { %v771_v2 = vmax.f32 %v769_v62, %v770_v14  ;;  %v2369_v62 = vsub.s32 %v820_v8, %v822_v46  ;;  %v2375_v14 = vsub.s32 0, %v822_v46 }
 0x21d   : > { %v808_v32 = vmax.f32 %v806_v6, %v807_v22 }
 0x21e   : > { %v772_v28 = vrot.slane %v771_v2, 4  ;;  %2981 = vst [vmem:[#allocation43_spill] sm:$0xff] %v2369_v62 }
 0x21f   : > { %v809_v26 = vrot.slane %v808_v32, 4 }
 0x220   : > { %v773_v10 = vmax.f32 %v771_v2, %v772_v28  ;;  %v740_v2 = vld [vmem:[#allocation2] sm:$0x3] }
 0x221   : > { %v810_v24 = vmax.f32 %v808_v32, %v809_v26  ;;  %v1704_v32 = vld [vmem:[%s343_s28 + $0x4] ss:$8 sps:$4 sm:$0xff]  }
 0x222   : > { %v774_v16 = vrot.slane %v773_v10, 2  ;;  %1233 = vmatprep.mubr.bf16.mxu1 %v1704_v32 }
 0x223   : > { %v811_v34 = vrot.slane %v810_v24, 2 }
 0x224   : > { %v775_v42 = vmax.f32 %v773_v10, %v774_v16  ;;  %v2377_v16 = vsub.s32 1, %v822_v46  ;;  %v3007_v46 = vld [vmem:[#allocation41_spill] sm:$0xff] }
 0x225   : > { %v812_v12 = vmax.f32 %v810_v24, %v811_v34  ;;  %v2982_v24 = vmov 0 }
 0x226   : > { %v776_v50 = vrot.slane %v775_v42, 1  ;;  %v2983_v24 = vsel %vm2379_vm3, 4294967295, %v2982_v24 }
 0x227   : > { %v813_v4 = vrot.slane %v812_v12, 1  ;;  %2984 = vst [vmem:[#allocation44_spill] sm:$0xff] %v2983_v24  ;;  %v3001_v24 = vld [vmem:[#allocation35_spill] sm:$0xff] }
 0x228   : > { %v777_v0 = vmax.f32 %v775_v42, %v776_v50 }
 0x229   : > { %v814_v54 = vmax.f32 %v812_v12, %v813_v4 }
 0x22b   : > { %v817_v6 = vcombine.low %v777_v0, %v814_v54  ;;  %v3006_v54 = vld [vmem:[#allocation40_spill] sm:$0xff] }
 0x22d   : > { %v824_v28 = vrot.slane %v817_v6, %v2369_v62  ;;  %v3003_v6 = vld [vmem:[#allocation37_spill] sm:$0xff] }
 0x22f   : > { %v831_v20 = vrot.slane %v824_v28, %v2369_v62  ;;  %v3004_v28 = vld [vmem:[#allocation38_spill] sm:$0xff] }
 0x231   : > { %v833_v4 = vmax.f32 %v740_v2, %v831_v20  ;;  %v2986_v20 = vld [vmem:[#allocation20_spill] sm:$0xff] }
 0x233   : > { %v834_v8 = vsub.f32 %v740_v2, %v833_v4  ;;  %v2384_v0 = vrot.slane %v833_v4, %v2375_v14  ;;  %v2387_v12 = vrot.slane %v833_v4, %v2377_v16  ;;  %1252 = vst.msk [vmem:[#allocation2] sm:$0x3] %vm2379_vm3, %v833_v4  ;;  %v2985_v2 = vld [vmem:[#allocation19_spill] sm:$0xff]  ;;  %v2987_v4 = vld [vmem:[#allocation21_spill] sm:$0xff] }
 0x235   : > { %v835_v34 = vmul.f32 1.442695, %v834_v8  ;;  %v2988_v8 = vld [vmem:[#allocation22_spill] sm:$0xff]  ;;  %v3008_v26 = vsub.f32 %v2177_v35, %v2384_v0  ;;  %v3009_v22 = vsub.f32 %v2179_v36, %v2387_v12  ;;  %v3010_v10 = vsub.f32 %v2181_v37, %v2384_v0 }
 0x236   : > { %v3011_v50 = vsub.f32 %v2183_v38, %v2387_v12  ;;  %v3012_v30 = vsub.f32 %v2185_v39, %v2384_v0  ;;  %v3013_v35 = vsub.f32 %v2189_v41, %v2387_v12  ;;  %v3015_v38 = vsub.f32 %v2197_v45, %v2387_v12 }
 0x237   : > { %v912_v62 = vmul.f32 1.442695, %v3008_v26  ;;  %v914_v18 = vmul.f32 1.442695, %v3009_v22  ;;  %1705 = vpow2.f32 %v835_v34  ;;  %v916_v32 = vmul.f32 1.442695, %v3010_v10 }
 0x238   : > { %v918_v42 = vmul.f32 1.442695, %v3011_v50  ;;  %v920_v58 = vmul.f32 1.442695, %v3012_v30  ;;  %v922_v36 = vmul.f32 1.442695, %v3013_v35  ;;  %v3014_v22 = vsub.f32 %v2193_v43, %v2384_v0 }
 0x239   : > { %1707 = vpow2.f32 %v912_v62  ;;  %v926_v50 = vmul.f32 1.442695, %v3015_v38  ;;  %v3016_v39 = vsub.f32 %v2201_v47, %v2384_v0  ;;  %v3017_v41 = vsub.f32 %v2204_v49, %v2387_v12 }
 0x23a   : > { %1709 = vpow2.f32 %v914_v18  ;;  %v924_v37 = vmul.f32 1.442695, %v3014_v22  ;;  %v3018_v43 = vsub.f32 %v2207_v51, %v2384_v0  ;;  %v3019_v45 = vsub.f32 %v2210_v53, %v2387_v12 }
 0x23b   : > { %1711 = vpow2.f32 %v916_v32  ;;  %v928_v62 = vmul.f32 1.442695, %v3016_v39  ;;  %v930_v10 = vmul.f32 1.442695, %v3017_v41  ;;  %v3020_v47 = vsub.f32 %v2213_v55, %v2384_v0 }
 0x23c   : > { %1713 = vpow2.f32 %v918_v42  ;;  %v932_v18 = vmul.f32 1.442695, %v3018_v43  ;;  %v934_v42 = vmul.f32 1.442695, %v3019_v45  ;;  %v3021_v49 = vsub.f32 %v2216_v57, %v2387_v12 }
 0x23d   : > { %1715 = vpow2.f32 %v920_v58  ;;  %v936_v58 = vmul.f32 1.442695, %v3020_v47  ;;  %v3022_v51 = vsub.f32 %v2219_v59, %v2384_v0  ;;  %v3023_v35 = vsub.f32 %v2222_v61, %v2387_v12 }
 0x23e   : > { %1717 = vpow2.f32 %v922_v36  ;;  %v938_v30 = vmul.f32 1.442695, %v3021_v49  ;;  %v3024_v22 = vsub.f32 %v2225_v63, %v2384_v0  ;;  %v3025_v38 = vsub.f32 %v2228_v1, %v2387_v12 }
 0x23f   : > { %1719 = vpow2.f32 %v924_v37  ;;  %v940_v32 = vmul.f32 1.442695, %v3022_v51  ;;  %v942_v55 = vmul.f32 1.442695, %v3023_v35  ;;  %v3026_v39 = vsub.f32 %v2231_v3, %v2384_v0 }
 0x240   : > { %1721 = vpow2.f32 %v926_v50  ;;  %v944_v37 = vmul.f32 1.442695, %v3024_v22  ;;  %v946_v50 = vmul.f32 1.442695, %v3025_v38  ;;  %v3027_v41 = vsub.f32 %v2234_v5, %v2387_v12 }
 0x241   : > { %1723 = vpow2.f32 %v928_v62  ;;  %v2558_v26 = vpop.eup %1705  ;;  %v948_v61 = vmul.f32 1.442695, %v3026_v39  ;;  %v3028_v43 = vsub.f32 %v2237_v7, %v2384_v0  ;;  %v3029_v45 = vsub.f32 %v2240_v9, %v2387_v12 }
 0x242   : > { %1725 = vpow2.f32 %v930_v10  ;;  %v950_v63 = vmul.f32 1.442695, %v3027_v41  ;;  %v3030_v3 = vsub.f32 %v2243_v11, %v2384_v0  ;;  %v3031_v5 = vsub.f32 %v2246_v13, %v2387_v12 }
 0x243   : > { %v1708_v34 = vpop.eup %1707  ;;  %1727 = vpow2.f32 %v932_v18  ;;  %v952_v1 = vmul.f32 1.442695, %v3028_v43  ;;  %v3032_v7 = vsub.f32 %v2249_v15, %v2384_v0  ;;  %v3033_v51 = vsub.f32 %v2252_v17, %v2387_v12 }
 0x244   : > { %v1710_v53 = vpop.eup %1709  ;;  %1729 = vpow2.f32 %v934_v42  ;;  %v954_v42 = vmul.f32 1.442695, %v3029_v45  ;;  %v956_v47 = vmul.f32 1.442695, %v3030_v3  ;;  %v958_v49 = vmul.f32 1.442695, %v3031_v5 }
 0x245   : > { %v1712_v36 = vpop.eup %1711  ;;  %1731 = vpow2.f32 %v936_v58  ;;  %v962_v9 = vmul.f32 1.442695, %v3033_v51  ;;  %v3034_v11 = vsub.f32 %v2255_v19, %v2384_v0 }
 0x246   : > { %v1714_v57 = vpop.eup %1713  ;;  %1733 = vpow2.f32 %v938_v30  ;;  %v960_v30 = vmul.f32 1.442695, %v3032_v7  ;;  %v1042_v13 = vadd.f32 %v1712_v36, %v1708_v34  ;;  %v3038_v7 = vsub.f32 %v2267_v27, %v2384_v0 }
 0x247   : > { %v2575_v59 = vpop.eup %1715  ;;  %1735 = vpow2.f32 %v940_v32  ;;  %v964_v35 = vmul.f32 1.442695, %v3034_v11  ;;  %v1079_v38 = vadd.f32 %v1714_v57, %v1710_v53  ;;  %v1160_v15 = vpack.c.bf16 %v1714_v57, %v1710_v53 }
 0x248   : > { %v1718_v62 = vpop.eup %1717  ;;  %1737 = vpow2.f32 %v942_v55  ;;  %v3035_v55 = vsub.f32 %v2258_v21, %v2387_v12  ;;  %v1043_v17 = vadd.f32 %v2575_v59, %v1042_v13  ;;  %v2620_v53 = vrot.slane %v2558_v26, %v2377_v16 }
 0x249   : > { %v1720_v10 = vpop.eup %1719  ;;  %1739 = vpow2.f32 %v944_v37  ;;  %v1080_v19 = vadd.f32 %v1718_v62, %v1079_v38  ;;  %1201 = vmatprep.subr.bf16.mxu1 %v1160_v15  ;;  %v3036_v57 = vsub.f32 %v2261_v23, %v2384_v0  ;;  %v972_v23 = vmul.f32 1.442695, %v3038_v7 }
 0x24a   : > { %v1722_v18 = vpop.eup %1721  ;;  %1741 = vpow2.f32 %v946_v50  ;;  %v966_v22 = vmul.f32 1.442695, %v3035_v55  ;;  %v1159_v50 = vpack.c.bf16 %v1712_v36, %v1708_v34  ;;  %v1161_v41 = vpack.c.bf16 %v1720_v10, %v2575_v59 }
 0x24b   : > { %v2592_v58 = vpop.eup %1723  ;;  %1743 = vpow2.f32 %v948_v61  ;;  %v1162_v61 = vpack.c.bf16 %v1722_v18, %v1718_v62  ;;  %v2616_v34 = vrot.slane %v2558_v26, %v2375_v14  ;;  %v968_v59 = vmul.f32 1.442695, %v3036_v57 }
 0x24c   : > { %v1726_v32 = vpop.eup %1725  ;;  %1745 = vpow2.f32 %v950_v63  ;;  %1202 = vmatpush1.bf16.msra.mxu1 %v1159_v50  ;;  %v1081_v62 = vadd.f32 %v1722_v18, %v1080_v19  ;;  %v3040_v55 = vsub.f32 %v2273_v31, %v2384_v0  ;;  %v3042_v15 = vsub.f32 %v2279_v40, %v2384_v0 }
 0x24d   : > { %v1728_v37 = vpop.eup %1727  ;;  %1747 = vpow2.f32 %v952_v1  ;;  %v1044_v1 = vadd.f32 %v1720_v10, %v1043_v17  ;;  %1203 = vmatprep.subr.bf16.mxu1 %v1162_v61  ;;  %v3037_v10 = vsub.f32 %v2264_v25, %v2387_v12  ;;  %v3043_v61 = vsub.f32 %v2282_v44, %v2387_v12 }
 0x24e   : > { %v1730_v39 = vpop.eup %1729  ;;  %1749 = vpow2.f32 %v954_v42  ;;  %v1163_v43 = vpack.c.bf16 %v1728_v37, %v2592_v58  ;;  %v980_v31 = vmul.f32 1.442695, %v3042_v15  ;;  %v3044_v19 = vsub.f32 %v2285_v48, %v2384_v0  ;;  %v3054_v15 = vld [vmem:[#allocation24_spill] sm:$0xff] }
 0x24f   : > { %v2611_v63 = vpop.eup %1731  ;;  %1751 = vpow2.f32 %v956_v47  ;;  %v1164_v21 = vpack.c.bf16 %v1730_v39, %v1726_v32  ;;  %v970_v3 = vmul.f32 1.442695, %v3037_v10  ;;  %v1045_v47 = vadd.f32 %v2592_v58, %v1044_v1 }
 0x250   : > { %v1734_v45 = vpop.eup %1733  ;;  %1753 = vpow2.f32 %v958_v49  ;;  %1204 = vmatpush1.bf16.msra.mxu1 %v1161_v41  ;;  %v3048_v7 = vsub.f32 %v2985_v2, %v2384_v0 }
 0x251   : > { %v1736_v36 = vpop.eup %1735  ;;  %1755 = vpow2.f32 %v960_v30  ;;  %v1082_v30 = vadd.f32 %v1726_v32, %v1081_v62  ;;  %v1046_v11 = vadd.f32 %v1728_v37, %v1045_v47  ;;  %1205 = vmatprep.subr.bf16.mxu1 %v1164_v21  ;;  %v3041_v32 = vsub.f32 %v2276_v33, %v2387_v12 }
 0x252   : > { %v1738_v42 = vpop.eup %1737  ;;  %1757 = vpow2.f32 %v962_v9  ;;  %v1165_v5 = vpack.c.bf16 %v1736_v36, %v2611_v63  ;;  %v3039_v9 = vsub.f32 %v2270_v29, %v2387_v12  ;;  %v982_v33 = vmul.f32 1.442695, %v3043_v61 }
 0x253   : > { %v2630_v49 = vpop.eup %1739  ;;  %1759 = vpow2.f32 %v964_v35  ;;  %v1166_v18 = vpack.c.bf16 %v1738_v42, %v1734_v45  ;;  %v976_v35 = vmul.f32 1.442695, %v3040_v55  ;;  %v1083_v13 = vadd.f32 %v1730_v39, %v1082_v30 }
 0x254   : > { %v1742_v51 = vpop.eup %1741  ;;  %1761 = vpow2.f32 %v966_v22  ;;  %v974_v25 = vmul.f32 1.442695, %v3039_v9  ;;  %v978_v22 = vmul.f32 1.442695, %v3041_v32  ;;  %v1047_v38 = vadd.f32 %v2611_v63, %v1046_v11  ;;  %1206 = vmatpush1.bf16.msra.mxu1 %v1163_v43  ;;  %v3052_v32 = vld [vmem:[#allocation23_spill] sm:$0xff] }
 0x255   : > { %v1744_v58 = vpop.eup %1743  ;;  %1763 = vpow2.f32 %v968_v59  ;;  %v1084_v50 = vadd.f32 %v1734_v45, %v1083_v13  ;;  %v984_v21 = vmul.f32 1.442695, %v3044_v19  ;;  %1207 = vmatprep.subr.bf16.mxu1 %v1166_v18  ;;  %v3045_v45 = vsub.f32 %v2288_v52, %v2387_v12 }
 0x256   : > { %v1746_v27 = vpop.eup %1745  ;;  %1765 = vpow2.f32 %v970_v3  ;;  %v1167_v29 = vpack.c.bf16 %v1744_v58, %v2630_v49  ;;  %v1048_v41 = vadd.f32 %v1736_v36, %v1047_v38  ;;  %v3046_v43 = vsub.f32 %v2291_v56, %v2384_v0 }
 0x257   : > { %v2646_v37 = vpop.eup %1747  ;;  %1767 = vpow2.f32 %v972_v23  ;;  %v1168_v39 = vpack.c.bf16 %v1746_v27, %v1742_v51  ;;  %v1085_v1 = vadd.f32 %v1738_v42, %v1084_v50  ;;  %v986_v57 = vmul.f32 1.442695, %v3045_v45 }
 0x258   : > { %v1750_v17 = vpop.eup %1749  ;;  %1769 = vpow2.f32 %v974_v25  ;;  %v1049_v59 = vadd.f32 %v2630_v49, %v1048_v41  ;;  %v988_v48 = vmul.f32 1.442695, %v3046_v43  ;;  %v3047_v3 = vsub.f32 %v2294_v60, %v2387_v12  ;;  %1208 = vmatpush1.bf16.msra.mxu1 %v1165_v5 }
 0x259   : > { %v1752_v63 = vpop.eup %1751  ;;  %1771 = vpow2.f32 %v976_v35  ;;  %v1086_v62 = vadd.f32 %v1742_v51, %v1085_v1  ;;  %v992_v23 = vmul.f32 1.442695, %v3048_v7  ;;  %1209 = vmatprep.subr.bf16.mxu1 %v1168_v39  ;;  %v3049_v18 = vsub.f32 %v2986_v20, %v2387_v12 }
 0x25a   : > { %v1754_v40 = vpop.eup %1753  ;;  %1773 = vpow2.f32 %v978_v22  ;;  %v1169_v44 = vpack.c.bf16 %v1752_v63, %v2646_v37  ;;  %v990_v52 = vmul.f32 1.442695, %v3047_v3  ;;  %v1050_v47 = vadd.f32 %v1744_v58, %v1049_v59  ;;  %v3060_v59 = vld [vmem:[#allocation27_spill] sm:$0xff] }
 0x25b   : > { %v2662_v36 = vpop.eup %1755  ;;  %1775 = vpow2.f32 %v980_v31  ;;  %v1170_v42 = vpack.c.bf16 %v1754_v40, %v1750_v17  ;;  %v1087_v30 = vadd.f32 %v1746_v27, %v1086_v62  ;;  %v994_v51 = vmul.f32 1.442695, %v3049_v18 }
 0x25c   : > { %v1758_v10 = vpop.eup %1757  ;;  %1777 = vpow2.f32 %v982_v33  ;;  %v1051_v9 = vadd.f32 %v2646_v37, %v1050_v47  ;;  %v3050_v5 = vsub.f32 %v2987_v4, %v2384_v0  ;;  %v3051_v35 = vsub.f32 %v2988_v8, %v2387_v12  ;;  %1210 = vmatpush1.bf16.msra.mxu1 %v1167_v29  ;;  %v3056_v29 = vld [vmem:[#allocation25_spill] sm:$0xff] }
 0x25d   : > { %v1760_v49 = vpop.eup %1759  ;;  %1779 = vpow2.f32 %v984_v21  ;;  %v1088_v11 = vadd.f32 %v1750_v17, %v1087_v30  ;;  %v3053_v22 = vsub.f32 %v3052_v32, %v2384_v0  ;;  %1211 = vmatprep.subr.bf16.mxu1 %v1170_v42  ;;  %v3055_v31 = vsub.f32 %v3054_v15, %v2387_v12  ;;  %v3058_v21 = vld [vmem:[#allocation26_spill] sm:$0xff]  ;;  %v3062_v42 = vld [vmem:[#allocation28_spill] sm:$0xff] }
 0x25e   : > { %v1762_v56 = vpop.eup %1761  ;;  %1781 = vpow2.f32 %v986_v57  ;;  %v1171_v60 = vpack.c.bf16 %v1760_v49, %v2662_v36  ;;  %v996_v2 = vmul.f32 1.442695, %v3050_v5  ;;  %v998_v20 = vmul.f32 1.442695, %v3051_v35 }
 0x25f   : > { %v2678_v25 = vpop.eup %1763  ;;  %1783 = vpow2.f32 %v988_v48  ;;  %v1172_v58 = vpack.c.bf16 %v1762_v56, %v1758_v10  ;;  %v1052_v13 = vadd.f32 %v1752_v63, %v1051_v9  ;;  %v1000_v38 = vmul.f32 1.442695, %v3053_v22 }
 0x260   : > { %v1766_v55 = vpop.eup %1765  ;;  %1785 = vpow2.f32 %v990_v52  ;;  %v1089_v37 = vadd.f32 %v1754_v40, %v1088_v11  ;;  %v1002_v50 = vmul.f32 1.442695, %v3055_v31  ;;  %v3057_v61 = vsub.f32 %v3056_v29, %v2384_v0  ;;  %1212 = vmatpush1.bf16.msra.mxu1 %v1169_v44  ;;  %v3064_v44 = vld [vmem:[#allocation29_spill] sm:$0xff]  ;;  %v3068_v11 = vld [vmem:[#allocation31_spill] sm:$0xff]  ;;  %v3074_v29 = vld [vmem:[#allocation34_spill] sm:$0xff] }
 0x261   : > { %v1768_v27 = vpop.eup %1767  ;;  %1787 = vpow2.f32 %v992_v23  ;;  %v1053_v39 = vadd.f32 %v2662_v36, %v1052_v13  ;;  %v3059_v1 = vsub.f32 %v3058_v21, %v2387_v12  ;;  %v3061_v36 = vsub.f32 %v3060_v59, %v2384_v0  ;;  %1213 = vmatprep.subr.bf16.mxu1 %v1172_v58 }
 0x262   : > { %v1770_v4 = vpop.eup %1769  ;;  %1789 = vpow2.f32 %v994_v51  ;;  %v1173_v8 = vpack.c.bf16 %v1768_v27, %v2678_v25  ;;  %v1004_v33 = vmul.f32 1.442695, %v3057_v61  ;;  %v1090_v41 = vadd.f32 %v1758_v10, %v1089_v37  ;;  %v3066_v51 = vld [vmem:[#allocation30_spill] sm:$0xff] }
 0x263   : > { %v2694_v17 = vpop.eup %1771  ;;  %1791 = vpow2.f32 %v996_v2  ;;  %v1174_v63 = vpack.c.bf16 %v1770_v4, %v1766_v55  ;;  %v1006_v40 = vmul.f32 1.442695, %v3059_v1  ;;  %v1054_v45 = vadd.f32 %v1760_v49, %v1053_v39 }
 0x264   : > { %v1774_v19 = vpop.eup %1773  ;;  %1793 = vpow2.f32 %v998_v20  ;;  %v1008_v43 = vmul.f32 1.442695, %v3061_v36  ;;  %v1091_v48 = vadd.f32 %v1762_v56, %v1090_v41  ;;  %v3063_v10 = vsub.f32 %v3062_v42, %v2387_v12  ;;  %1214 = vmatpush1.bf16.msra.mxu1 %v1171_v60  ;;  %v3072_v60 = vld [vmem:[#allocation33_spill] sm:$0xff] }
 0x265   : > { %v1776_v57 = vpop.eup %1775  ;;  %1795 = vpow2.f32 %v1000_v38  ;;  %v1055_v52 = vadd.f32 %v2678_v25, %v1054_v45  ;;  %v3065_v7 = vsub.f32 %v3064_v44, %v2384_v0  ;;  %v3067_v9 = vsub.f32 %v3066_v51, %v2387_v12  ;;  %1215 = vmatprep.subr.bf16.mxu1 %v1174_v63 }
 0x266   : > { %v1778_v62 = vpop.eup %1777  ;;  %1797 = vpow2.f32 %v1002_v50  ;;  %v1010_v3 = vmul.f32 1.442695, %v3063_v10  ;;  %v1175_v47 = vpack.c.bf16 %v1776_v57, %v2694_v17  ;;  %v1092_v30 = vadd.f32 %v1766_v55, %v1091_v48  ;;  %v3070_v55 = vld [vmem:[#allocation32_spill] sm:$0xff] }
 0x267   : > { %v2710_v49 = vpop.eup %1779  ;;  %1799 = vpow2.f32 %v1004_v33  ;;  %v1012_v23 = vmul.f32 1.442695, %v3065_v7  ;;  %v1176_v56 = vpack.c.bf16 %v1778_v62, %v1774_v19  ;;  %v1014_v5 = vmul.f32 1.442695, %v3067_v9 }
 0x268   : > { %v1782_v18 = vpop.eup %1781  ;;  %1801 = vpow2.f32 %v1006_v40  ;;  %v1056_v2 = vadd.f32 %v1768_v27, %v1055_v52  ;;  %v3069_v58 = vsub.f32 %v3068_v11, %v2384_v0  ;;  %v1093_v20 = vadd.f32 %v1770_v4, %v1092_v30  ;;  %1216 = vmatpush1.bf16.msra.mxu1 %v1173_v8 }
 0x269   : > { %v1784_v25 = vpop.eup %1783  ;;  %1803 = vpow2.f32 %v1008_v43  ;;  %v3071_v32 = vsub.f32 %v3070_v55, %v2387_v12  ;;  %v3073_v15 = vsub.f32 %v3072_v60, %v2384_v0  ;;  %v3075_v61 = vsub.f32 %v3074_v29, %v2387_v12  ;;  %1217 = vmatprep.subr.bf16.mxu1 %v1176_v56 }
 0x26a   : > { %v1016_v35 = vmul.f32 1.442695, %v3069_v58  ;;  %v1786_v13 = vpop.eup %1785  ;;  %1805 = vpow2.f32 %v1010_v3  ;;  %v1057_v38 = vadd.f32 %v2694_v17, %v1056_v2  ;;  %v1177_v37 = vpack.c.bf16 %v1784_v25, %v2710_v49  ;;  %v3085_v58 = vld [vmem:[#allocation42_spill] sm:$0xff] }
 0x26b   : > { %v1018_v22 = vmul.f32 1.442695, %v3071_v32  ;;  %v2726_v27 = vpop.eup %1787  ;;  %1807 = vpow2.f32 %v1012_v23  ;;  %v1020_v31 = vmul.f32 1.442695, %v3073_v15  ;;  %v1094_v50 = vadd.f32 %v1774_v19, %v1093_v20  ;;  %v3077_v19 = vld [vmem:[#allocation36_spill] sm:$0xff] }
 0x26c   : > { %v1178_v4 = vpack.c.bf16 %v1786_v13, %v1782_v18  ;;  %v1790_v39 = vpop.eup %1789  ;;  %1809 = vpow2.f32 %v1014_v5  ;;  %v1022_v33 = vmul.f32 1.442695, %v3075_v61  ;;  %v1058_v41 = vadd.f32 %v1776_v57, %v1057_v38  ;;  %1218 = vmatpush1.bf16.msra.mxu1 %v1175_v47 }
 0x26d   : > { %v1792_v17 = vpop.eup %1791  ;;  %1811 = vpow2.f32 %v1016_v35  ;;  %v3076_v63 = vsub.f32 %v3001_v24, %v2384_v0  ;;  %v1095_v1 = vadd.f32 %v1778_v62, %v1094_v50  ;;  %v3078_v45 = vsub.f32 %v3077_v19, %v2387_v12 }
 0x26e   : > { %v1794_v40 = vpop.eup %1793  ;;  %1813 = vpow2.f32 %v1018_v22  ;;  %v1059_v36 = vadd.f32 %v2710_v49, %v1058_v41  ;;  %v1179_v43 = vpack.c.bf16 %v1792_v17, %v2726_v27  ;;  %v3079_v8 = vsub.f32 %v3003_v6, %v2384_v0  ;;  %v3081_v49 = vld [vmem:[#allocation39_spill] sm:$0xff]  ;;  %1219 = vmatprep.subr.bf16.mxu1 %v1178_v4 }
 0x26f   : > { %v1024_v21 = vmul.f32 1.442695, %v3076_v63  ;;  %v1026_v59 = vmul.f32 1.442695, %v3078_v45  ;;  %v1796_v57 = vpop.eup %1795  ;;  %1815 = vpow2.f32 %v1020_v31  ;;  %v1096_v24 = vadd.f32 %v1782_v18, %v1095_v1 }
 0x270   : > { %v1028_v48 = vmul.f32 1.442695, %v3079_v8  ;;  %v1180_v42 = vpack.c.bf16 %v1794_v40, %v1790_v39  ;;  %v1798_v62 = vpop.eup %1797  ;;  %1817 = vpow2.f32 %v1022_v33  ;;  %v3080_v10 = vsub.f32 %v3004_v28, %v2387_v12  ;;  %1220 = vmatpush1.bf16.msra.mxu1 %v1177_v37 }
 0x271   : > { %v1060_v52 = vadd.f32 %v1784_v25, %v1059_v36  ;;  %v1800_v44 = vpop.eup %1799  ;;  %1819 = vpow2.f32 %v1024_v21  ;;  %v3082_v7 = vsub.f32 %v3081_v49, %v2384_v0  ;;  %v1097_v30 = vadd.f32 %v1786_v13, %v1096_v24 }
 0x272   : > { %v1030_v3 = vmul.f32 1.442695, %v3080_v10  ;;  %v1802_v6 = vpop.eup %1801  ;;  %1821 = vpow2.f32 %v1026_v59  ;;  %v3083_v56 = vsub.f32 %v3006_v54, %v2387_v12  ;;  %v1181_v28 = vpack.c.bf16 %v1800_v44, %v1796_v57  ;;  %1221 = vmatprep.subr.bf16.mxu1 %v1180_v42 }
 0x273   : > { %v1032_v23 = vmul.f32 1.442695, %v3082_v7  ;;  %v1061_v51 = vadd.f32 %v2726_v27, %v1060_v52  ;;  %v1804_v9 = vpop.eup %1803  ;;  %1823 = vpow2.f32 %v1028_v48  ;;  %v3084_v47 = vsub.f32 %v3007_v46, %v2384_v0 }
 0x274   : > { %v1034_v18 = vmul.f32 1.442695, %v3083_v56  ;;  %v1098_v2 = vadd.f32 %v1790_v39, %v1097_v30  ;;  %v1182_v25 = vpack.c.bf16 %v1802_v6, %v1798_v62  ;;  %v1806_v11 = vpop.eup %1805  ;;  %1825 = vpow2.f32 %v1030_v3  ;;  %1222 = vmatpush1.bf16.msra.mxu1 %v1179_v43  ;;  %v1702_v56 = vld [vmem:[%s343_s28] ss:$8 sps:$4 sm:$0xff]  }
 0x275   : > { %v1036_v5 = vmul.f32 1.442695, %v3084_v47  ;;  %v3086_v35 = vsub.f32 %v3085_v58, %v2387_v12  ;;  %v1062_v13 = vadd.f32 %v1792_v17, %v1061_v51  ;;  %v1808_v54 = vpop.eup %1807  ;;  %1827 = vpow2.f32 %v1032_v23 }
 0x276   : > { %v1099_v55 = vadd.f32 %v1794_v40, %v1098_v2  ;;  %v1810_v32 = vpop.eup %1809  ;;  %1829 = vpow2.f32 %v1034_v18  ;;  %v1183_v38 = vpack.c.bf16 %v1808_v54, %v1804_v9  ;;  %1223 = vmatprep.subr.bf16.mxu1 %v1182_v25 }
 0x277   : > { %v1038_v20 = vmul.f32 1.442695, %v3086_v35  ;;  %v1063_v22 = vadd.f32 %v1796_v57, %v1062_v13  ;;  %v1812_v0 = vpop.eup %1811  ;;  %1831 = vpow2.f32 %v1036_v5  ;;  %v1184_v27 = vpack.c.bf16 %v1810_v32, %v1806_v11  ;;  %v3087_v13 = vld [vmem:[#allocation43_spill] sm:$0xff] }
 0x278   : > { %v1100_v46 = vadd.f32 %v1798_v62, %v1099_v55  ;;  %v1814_v60 = vpop.eup %1813  ;;  %1224 = vmatpush1.bf16.msra.mxu1 %v1181_v28 }
 0x279   : > { %1833 = vpow2.f32 %v1038_v20  ;;  %v1064_v15 = vadd.f32 %v1800_v44, %v1063_v22  ;;  %v1816_v12 = vpop.eup %1815  ;;  %1225 = vmatprep.subr.bf16.mxu1 %v1184_v27  ;;  %v1040_v20 = vld [vmem:[#allocation3] sm:$0x3]  ;;  %v1142_v27 = vld [vmem:[#allocation4 + $0x10] sm:$0xff] }
 0x27a   : > { %v1101_v31 = vadd.f32 %v1802_v6, %v1100_v46  ;;  %v1818_v37 = vpop.eup %1817  ;;  %v1185_v4 = vpack.c.bf16 %v1816_v12, %v1812_v0  ;;  %v1041_v55 = vmul.f32 %v2558_v26, %v1040_v20  ;;  %v1141_v46 = vld [vmem:[#allocation4 + $0x8] sm:$0xff] }
 0x27b   : > { %v1065_v50 = vadd.f32 %v1804_v9, %v1064_v15  ;;  %v1820_v39 = vpop.eup %1819  ;;  %v1186_v61 = vpack.c.bf16 %v1818_v37, %v1814_v60  ;;  %v1143_v15 = vld [vmem:[#allocation4 + $0x18] sm:$0xff] }
 0x27c   : > { %v1102_v29 = vadd.f32 %v1806_v11, %v1101_v31  ;;  %v1822_v33 = vpop.eup %1821  ;;  %1226 = vmatpush1.bf16.msra.mxu1 %v1183_v38  ;;  %v1156_v31 = vmul.f32 %v2620_v53, %v1141_v46 }
 0x27d   : > { %v1066_v41 = vadd.f32 %v1808_v54, %v1065_v50  ;;  %v1824_v17 = vpop.eup %1823  ;;  %1227 = vmatprep.subr.bf16.mxu1 %v1186_v61 }
 0x27e   : > { %v1103_v63 = vadd.f32 %v1810_v32, %v1102_v29  ;;  %v1826_v21 = vpop.eup %1825  ;;  %v1187_v40 = vpack.c.bf16 %v1824_v17, %v1820_v39  ;;  %v1158_v29 = vmul.f32 %v2620_v53, %v1143_v15 }
 0x27f   : > { %v1067_v1 = vadd.f32 %v1812_v0, %v1066_v41  ;;  %v1828_v19 = vpop.eup %1827  ;;  %v1188_v59 = vpack.c.bf16 %v1826_v21, %v1822_v33  ;;  %v1140_v0 = vld [vmem:[#allocation4] sm:$0xff] }
 0x280   : > { %v1104_v45 = vadd.f32 %v1814_v60, %v1103_v63  ;;  %v1830_v36 = vpop.eup %1829  ;;  %1228 = vmatpush1.bf16.msra.mxu1 %v1185_v4  ;;  %v1155_v60 = vmul.f32 %v2616_v34, %v1140_v0  ;;  %v1157_v4 = vmul.f32 %v2616_v34, %v1142_v27  ;;  %v1971_v63 = vmov (!%p1578_p9), 0  }
 0x281   : > { %v1068_v43 = vadd.f32 %v1816_v12, %v1067_v1  ;;  %v1832_v57 = vpop.eup %1831  ;;  %1229 = vmatprep.subr.bf16.mxu1 %v1188_v59  ;;  %1341 = vmatprep.mubr.bf16.mxu0 (!%p1578_p9), %v1971_v63 }
 0x282   : > { %v1105_v8 = vadd.f32 %v1818_v37, %v1104_v45  ;;  %v1189_v42 = vpack.c.bf16 %v1832_v57, %v1828_v19 }
 0x283   : > { %v1834_v48 = vpop.eup %1833  ;;  %v1069_v24 = vadd.f32 %v1820_v39, %v1068_v43 }
 0x284   : > { %v1106_v62 = vadd.f32 %v1822_v33, %v1105_v8  ;;  %v1190_v10 = vpack.c.bf16 %v1834_v48, %v1830_v36  ;;  %1230 = vmatpush1.bf16.msra.mxu1 %v1187_v40 }
 0x285   : > { %v1070_v3 = vadd.f32 %v1824_v17, %v1069_v24  ;;  %v1284_v24 = vld [vmem:[%s2156_s27] sm:$0xff] (!%p1578_p9) }
 0x286   : > { %v1107_v52 = vadd.f32 %v1826_v21, %v1106_v62  ;;  %1231 = vmatprep.subr.bf16.mxu1 %v1190_v10  ;;  %v1285_v62 = vld [vmem:[%s2156_s27 + $0x8] sm:$0xff] (!%p1578_p9) }
 0x287   : > { %v1071_v44 = vadd.f32 %v1828_v19, %v1070_v3  ;;  %v1289_v10 = vld [vmem:[%s2156_s27 + $0x28] sm:$0xff] (!%p1578_p9) }
 0x288   : > { %v1108_v49 = vadd.f32 %v1830_v36, %v1107_v52  ;;  %1232 = vmatpush1.bf16.msra.mxu1 %v1189_v42  ;;  %v1288_v42 = vld [vmem:[%s2156_s27 + $0x20] sm:$0xff] (!%p1578_p9) }
 0x289   : > { %v1072_v7 = vadd.f32 %v1832_v57, %v1071_v44  ;;  %v1286_v44 = vld [vmem:[%s2156_s27 + $0x10] sm:$0xff] (!%p1578_p9) }
 0x28a   : > { %v1109_v23 = vadd.f32 %v1834_v48, %v1108_v49  ;;  %v1290_v49 = vld [vmem:[%s2156_s27 + $0x30] sm:$0xff] (!%p1578_p9) }
 0x28b   : > { %v1073_v30 = vrot.slane %v1072_v7, 4  ;;  %1234 = vmatmul.mubr.bf16.vlgmr.msra.gmra.mrb[0].mxu1 %v1702_v56  ;;  %v1287_v56 = vld [vmem:[%s2156_s27 + $0x18] sm:$0xff] (!%p1578_p9) }
 0x28c   : > { %v1110_v6 = vrot.slane %v1109_v23, 4  ;;  %1351 = vmatprep.mubr.bf16.mxu1 (!%p1578_p9), %v1971_v63 }
 0x28d   : > { %v1074_v18 = vadd.f32 %v1073_v30, %v1072_v7 }
 0x28e   : > { %v1111_v51 = vadd.f32 %v1110_v6, %v1109_v23 }
 0x28f   : > { %v1075_v28 = vrot.slane %v1074_v18, 2 }
 0x290   : > { %v1112_v9 = vrot.slane %v1111_v51, 2 }
 0x291   : > { %v1076_v47 = vadd.f32 %v1075_v28, %v1074_v18  ;;  %v1291_v18 = vld [vmem:[%s2156_s27 + $0x38] sm:$0xff] (!%p1578_p9) }
 0x292   : > { %v1113_v5 = vadd.f32 %v1112_v9, %v1111_v51 }
 0x293   : > { %v1077_v2 = vrot.slane %v1076_v47, 1 }
 0x294   : > { %v1114_v25 = vrot.slane %v1113_v5, 1 }
 0x295   : > { %v1078_v11 = vadd.f32 %v1077_v2, %v1076_v47 }
 0x296   : > { %v1115_v58 = vadd.f32 %v1114_v25, %v1113_v5 }
 0x298   : > { %v1118_v35 = vcombine.low %v1078_v11, %v1115_v58 }
 0x29a   : > { %v1125_v54 = vrot.slane %v1118_v35, %v3087_v13 }
 0x29c   : > { %v1132_v32 = vrot.slane %v1125_v54, %v3087_v13 }
 0x29e   : > { %v1134_v22 = vadd.f32 %v1132_v32, %v1041_v55 }
 0x2a0   : > { %1139 = vst.msk [vmem:[#allocation3] sm:$0x3] %vm2379_vm3, %v1134_v22 }
 0x2a7   : > { %v1261_v17 = vld [vmem:[#allocation3] sm:$0x3] (!%p1578_p9) }
 0x2a8   : > { %1837 = vrcp.f32 (!%p1578_p9), %v1261_v17 }
 0x2b2   : > { %v1838_v21 = vpop.eup (!%p1578_p9), %1837 }
 0x2b3   : > { %v1271_v19 = vrot.slane (!%p1578_p9), %v1838_v21, %v2377_v16  ;;  %v1267_v45 = vrot.slane (!%p1578_p9), %v1838_v21, %v2375_v14  ;;  %v1835_v16 = vld [vmem:[%s2877_s4] sm:$0xff] (!%p1578_p9)   ;;  %v1836_v14 = vld [vmem:[%s2877_s4 + $0x8] sm:$0xff] (!%p1578_p9)  }
 0x35e   : > { %v1235_v12 = vpop.f32.mrb[0].mxu1  ;;  %1256 = sbr.rel (%p1578_p9) target bundleno = 1102 (0x44e), region = 109 }
 0x35f   : > { %v1244_v37 = vadd.f32 %v1235_v12, %v1155_v60  ;;  %v1237_v50 = vpop.f32.mrb[1].mxu1 }
 0x360   : > { %v1245_v26 = vadd.f32 %v1237_v50, %v1156_v31  ;;  %v1239_v39 = vpop.f32.mrb[2].mxu1 }
 0x361   : > { %1248 = vst [vmem:[#allocation4] sm:$0xff] %v1244_v37  ;;  %v1246_v61 = vadd.f32 %v1239_v39, %v1157_v4  ;;  %v1241_v33 = vpop.f32.mrb[3].mxu1 }
 0x362   : > { %1249 = vst [vmem:[#allocation4 + $0x8] sm:$0xff] %v1245_v26  ;;  %v1247_v41 = vadd.f32 %v1241_v33, %v1158_v29 }
 0x363   : > { %1250 = vst [vmem:[#allocation4 + $0x10] sm:$0xff] %v1246_v61 }
 0x364   : > { %1251 = vst [vmem:[#allocation4 + $0x18] sm:$0xff] %v1247_v41 }
 0x368   : > { %v1257_v40 = vld [vmem:[#allocation4] sm:$0xff] }
 0x369   : > { %v1258_v34 = vld [vmem:[#allocation4 + $0x8] sm:$0xff]  ;;  %v1274_v43 = vmul.f32 %v1267_v45, %v1257_v40 }
 0x36a   : > { %v1259_v53 = vld [vmem:[#allocation4 + $0x10] sm:$0xff]  ;;  %v1275_v59 = vmul.f32 %v1271_v19, %v1258_v34 }
 0x36b   : > { %v1260_v1 = vld [vmem:[#allocation4 + $0x18] sm:$0xff]  ;;  %v1276_v57 = vmul.f32 %v1267_v45, %v1259_v53 }
 0x36c   : > { %v1277_v36 = vmul.f32 %v1271_v19, %v1260_v1 }
 0x36d   : > { %v1282_v48 = vpack.c.bf16 %v1276_v57, %v1274_v43 }
 0x36e   : > { %v1283_v8 = vpack.c.bf16 %v1277_v36, %v1275_v59 }
 0x370   : > { %1309 = vmatprep.subr.bf16.mxu0 %v1283_v8  ;;  %1589 = vmatprep.subr.bf16.mxu1 %v1283_v8 }
 0x371   : > { %1310 = vmatpush1.bf16.msra.mxu0 %v1282_v48  ;;  %1590 = vmatpush1.bf16.msra.mxu1 %v1282_v48 }
 0x374   : > { %1581 = vmatmul.mubr.msk.bf16.vlgmr.msra.gmra.mrb[0].mxu0 %vm1302_vm4, %v1835_v16  ;;  %1582 = vmatmul.mubr.msk.bf16.vlgmr.msra.gmra.mrb[0].mxu1 %vm1302_vm4, %v1836_v14 }
 0x447   : > { %v1343_v3 = vpop.f32.mrb[0].mxu0  ;;  %v1353_v52 = vpop.f32.mrb[0].mxu1 }
 0x448   : > { %v1344_v7 = vadd.f32 %v1343_v3, %v1284_v24  ;;  %v1354_v23 = vadd.f32 %v1353_v52, %v1288_v42  ;;  %v1345_v30 = vpop.f32.mrb[1].mxu0  ;;  %v1355_v6 = vpop.f32.mrb[1].mxu1 }
 0x449   : > { %v1346_v51 = vadd.f32 %v1345_v30, %v1285_v62  ;;  %v1356_v28 = vadd.f32 %v1355_v6, %v1289_v10  ;;  %v1347_v9 = vpop.f32.mrb[2].mxu0  ;;  %v1357_v47 = vpop.f32.mrb[2].mxu1 }
 0x44a   : > { %1362 = vst [vmem:[%s2158_s30] sm:$0xff] %v1344_v7  ;;  %1366 = vst [vmem:[%s2158_s30 + $0x20] sm:$0xff] %v1354_v23  ;;  %v1348_v5 = vadd.f32 %v1347_v9, %v1286_v44  ;;  %v1358_v2 = vadd.f32 %v1357_v47, %v1290_v49  ;;  %v1349_v25 = vpop.f32.mrb[3].mxu0  ;;  %v1359_v11 = vpop.f32.mrb[3].mxu1 }
 0x44b   : > { %1363 = vst [vmem:[%s2158_s30 + $0x8] sm:$0xff] %v1346_v51  ;;  %1367 = vst [vmem:[%s2158_s30 + $0x28] sm:$0xff] %v1356_v28  ;;  %v1350_v58 = vadd.f32 %v1349_v25, %v1287_v56  ;;  %v1360_v35 = vadd.f32 %v1359_v11, %v1291_v18 }
 0x44c   : > { %1364 = vst [vmem:[%s2158_s30 + $0x10] sm:$0xff] %v1348_v5  ;;  %1368 = vst [vmem:[%s2158_s30 + $0x30] sm:$0xff] %v1358_v2 }
 0x44d   : > { %1365 = vst [vmem:[%s2158_s30 + $0x18] sm:$0xff] %v1350_v58  ;;  %1369 = vst [vmem:[%s2158_s30 + $0x38] sm:$0xff] %v1360_v35 }
 0x44e PF: > { %s1585_s27 = sshll.u32 %s1949_s25, 4  ;;  %s1386_s8 = sshll.u32 %s2158_s30, 4  ;;  %s2800_s8 = int_to_ptr.vmem [resolvable:$true] %s1386_s8 }
 0x44f   : > { %s1383_s14 = sadd.s32 %s1585_s27, %s2142_s12  ;;  %s3089_s11 = sld [smem:[#allocation47_spill]] }
 0x450   : > { %s1586_s17 = sshll.u32 %s1383_s14, 7  ;;  %s3090_s5 = sand.u32 1, %s1925_s19  }
 0x451   : > { %s2809_s7 = scalar_lea.sflag [#allocation8], %s3090_s5  ;;  %s1839_s21 = scalar_lea.vmem %s2800_s8, 1024 }
 0x452   : > { %p1840_p10 = scmp.ne.s32.totalorder %s2800_s8, %s1839_s21  ;;  %s1972_s25 = smov [#allocation7]  }
 0x453   : > { %s1843_s30 = sshll.u32 %s1972_s25, 4  ;;  %s1844_s30 = int_to_ptr.vmem [resolvable:$false] %s1843_s30 }
 0x454   : > { %p1841_p13 = pnand %p1840_p10, %p2099_p11  ;;  %s1845_s12 = scalar_lea.vmem %s1844_s30, 2048 }
 0x455   : > { %s2805_s13 = scalar_lea.hbm %s3089_s11, %s1586_s17  ;;  %p1846_p1 = scmp.lt.s32.totalorder %s2800_s8, %s1844_s30 }
 0x456   : > { %p1842_p0 = pneg %p1841_p13  ;;  %p1847_p2 = scmp.lt.s32.totalorder %s1845_s12, %s1839_s21 }
 0x458   : > { %p1848_p3 = por %p1847_p2, %p1846_p1 }
 0x45a   : > { %p1849_p4 = pnand %p1848_p3, %p1842_p0 }
 0x45c   : > { %1852 = shalt.err (!%p1849_p4)
}
 0x45d   : > { %s1853_s10 = scalar_lea.hbm %s2805_s13, 1024  ;;  %s1857_s24 = scalar_lea.hbm %s3089_s11, 4096 }
 0x45e   : > { %p1854_p5 = scmp.ne.s32.totalorder %s2805_s13, %s1853_s10  ;;  %p1858_p8 = scmp.lt.u32.totalorder %s2805_s13, %s3089_s11 }
 0x45f   : > { %p1859_p9 = scmp.lt.u32.totalorder %s1857_s24, %s1853_s10  ;;  %p1861_p13 = scmp.lt.u32.totalorder %s1853_s10, %s2805_s13 }
 0x460   : > { %p1855_p6 = pnand %p1854_p5, %p2099_p11 }
 0x461   : > { %p1860_p10 = por %p1859_p9, %p1858_p8 }
 0x462   : > { %p1856_p7 = pneg %p1855_p6 }
 0x463   : > { %p1862_p0 = por %p1861_p13, %p1860_p10 }
 0x465   : > { %p1863_p1 = pnand %p1862_p0, %p1856_p7 }
 0x467   : > { %1866 = shalt.err (!%p1863_p1)
}
 0x468   : > { %s1973_s23 = smov 256   ;;  %s1974_s28 = smov 512  }
 0x469   : > { %s1975_s27 = smov 16  }
 0x46a   : > { %1591 = dma.vmem_to_hbm [thread:$0]  (%p2099_p11), %s2800_s8, 1024, %s2805_s13, %s2809_s7, %s1973_s23, %s1974_s28, %s1975_s27  }
 0x46b PF: > { %s3091_s14 = sld [smem:[#allocation10_spill]]  ;;  %p1597_p2 = scmp.ge.s32.totalorder %s1965_s29, 2 }
 0x46d   : > { %p1594_p3 = pnand %p1597_p2, %p2103_p12 }
 0x471   : > { %s1401_s16 = sand.u32 1, %s3091_s14  }
 0x472   : > { %s1402_s9 = scalar_lea.sflag [#allocation8], %s1401_s16 }
 0x473   : > { %1916 = dma.done.wait (!%p1594_p3), %s1402_s9, 1024  }
 0x474   : > { %1918 = vsyncadd (!%p1594_p3), %s1402_s9, 4294966272  ;;  %s18_s29 = sadd.s32 1, %s1965_s29   ;;  %s3093_s15 = sld [smem:[#allocation18_spill]] }
 0x475   : > { %p15_p4 = scmp.ge.s32.totalorder %s18_s29, 10   ;;  %s3094_s23 = sld [smem:[#allocation11_spill]] }
 0x476   : > { %s3095_s24 = sld [smem:[#allocation12_spill]]  ;;  %s3096_s25 = sld [smem:[#allocation13_spill]] }
 0x477   : > { %s3097_s26 = sld [smem:[#allocation14_spill]]  ;;  %s3098_s27 = sld [smem:[#allocation15_spill]] }
 0x478   : > { %s3099_s28 = sld [smem:[#allocation16_spill]]  ;;  %s3100_s18 = smov %s1925_s19 }
 0x479   : > { %s3101_s19 = smov %s1929_s20  ;;  %s3102_s20 = smov %s2114_s6 }
 0x47a   : > { %s3103_s21 = smov %s1937_s22  ;;  %s3104_s22 = smov %s3093_s15 }
 0x47b   :  { %17 = sbr.rel (!%p15_p4) target bundleno = 11 (0xb), region = 163 }
 0x482   :  { %1407 = vsyncpa [#allocation8], 1 }
 0x483   :  { %1409 = vsyncpa [#allocation8 + $0x1], 1 }

</bundles_post_ra>
